<compile_context>
chip_gen: v5e
topology: v5e:2x2
jax: 0.10.0
libtpu: 0.0.40
codegen_flags: <defaults>
</compile_context>

<pallas_src>
import jax
import jax.numpy as jnp
from jax.experimental import pallas as pl
from jax.experimental.pallas import tpu as pltpu

SMALL_EPS = 1e-10


def _custom_loss_kernel(iota_ref, logits_ref, side_ref, out_ref,
                        m_sc, d_sc, f_sc):
    # iota_ref   : (1, TV)  f32 global token indices for this vocab chunk
    # logits_ref : (TN, TV) f32 or bf16
    # side_ref   : (TN, 4)  f32 columns: [label + eps, lo, hi, 1/ub]
    # out_ref    : (TN, 1)  f32 per-row loss_k (written on last vocab chunk)
    # m_sc/d_sc/f_sc : (TN, 1) f32 online-softmax accumulators
    c = pl.program_id(1)

    @pl.when(c == 0)
    def _init():
        m_sc[...] = jnp.full_like(m_sc, -jnp.inf)
        d_sc[...] = jnp.zeros_like(d_sc)
        f_sc[...] = jnp.zeros_like(f_sc)

    raw = logits_ref[...]
    # Row max on the raw tile: packed bf16 max (2x elems/op) when input is bf16.
    chunk_max = jnp.max(raw, axis=-1, keepdims=True).astype(jnp.float32)
    logits = raw.astype(jnp.float32)

    side = side_ref[...]
    labels_eps = side[:, 0:1]        # label + small_eps (folded on host)
    lo = side[:, 1:2]
    hi = side[:, 2:3]
    inv_ub = side[:, 3:4]

    i = iota_ref[...]                # (1, TV), broadcasts against (TN, 1)

    # Online-softmax rescale of the running accumulators.
    m_old = m_sc[...]
    m_new = jnp.maximum(m_old, chunk_max)
    rescale = jnp.exp(m_old - m_new)               # (TN, 1); 0 on first chunk

    e = jnp.exp(logits - m_new)                    # (TN, TV)
    mask = (i >= lo) & (i <= hi)
    dist = jnp.abs(labels_eps - i)

    fused_c = jnp.sum(jnp.where(mask, e * (dist * inv_ub - 1.0), 0.0),
                      axis=-1, keepdims=True)      # (TN, 1)
    denom_c = jnp.sum(e, axis=-1, keepdims=True)   # (TN, 1)

    d_sc[...] = rescale * d_sc[...] + denom_c
    f_sc[...] = rescale * f_sc[...] + fused_c
    m_sc[...] = m_new

    @pl.when(c == pl.num_programs(1) - 1)
    def _finalize():
        # loss_k = (loss_reg + loss_class)/ub = 1 + fused / denom
        out_ref[...] = 1.0 + f_sc[...] * pl.reciprocal(d_sc[...])


def _vmem_config():
    """(tile working-set budget, vmem_limit_bytes), generation-aware."""
    try:
        cap = int(pltpu.get_tpu_info().vmem_capacity_bytes)
    except Exception:
        cap = 64 << 20
    if cap <= (64 << 20):            # v7x-class: 64 MiB VMEM per TensorCore
        return 20 << 20, 36 << 20
    return 32 << 20, 56 << 20        # v5e / v6e: 128 MiB VMEM


def _choose_tiles(n, v, in_dtype, budget_bytes, *, tn_cap=512, tv_cap=2048,
                  min_row_steps=4):
    """Pick (tn, tv): vocab chunks bound the working set independent of V;
    row tiles prefer >= min_row_steps grid steps (>= 2 per TC on v7x)."""
    in_bytes = jnp.dtype(in_dtype).itemsize
    row_mult = 16 if (in_bytes < 4 and n % 16 == 0) else 8

    # Vocab chunk: largest multiple of 128 dividing v, capped at tv_cap.
    if v <= tv_cap:
        tv = v
    else:
        tv = 128
        for d in range(128, tv_cap + 1, 128):
            if v % d == 0:
                tv = d

    # Row tile: largest multiple of row_mult dividing n inside the budget.
    # Working set ~ double-buffered logits block + ~6 live (tn, tv) f32 planes.
    per_row = tv * (2 * in_bytes + 6 * 4)
    tn = int(min(tn_cap, n, max(row_mult, budget_bytes // per_row)))
    tn -= tn % row_mult
    tn = max(tn, row_mult)
    while tn > row_mult and (n % tn != 0 or n // tn < min_row_steps):
        tn -= row_mult
    if n % tn != 0:
        tn = row_mult if n % row_mult == 0 else 8
    return tn, tv


def custom_loss(logits, labels, token_lo, token_hi, *, small_eps=SMALL_EPS,
                tn=None, tv=None):
    """logits: (N, V) float32/bfloat16; labels: (N,) int32 token ids.
    token_lo/token_hi: (V,) int32 lookup tables mapping each token id to the
    inclusive token range of its event type (stand-in for Vocabulary).
    NOTE: ragged N must be padded by the caller (and padded rows masked out of
    the mean) before calling."""
    n, v = logits.shape
    assert n % 8 == 0 and v % 128 == 0
    assert v < (1 << 24), "f32 token-index plane is exact only for V < 2^24"

    budget_bytes, vmem_limit_bytes = _vmem_config()
    auto_tn, auto_tv = _choose_tiles(n, v, logits.dtype, budget_bytes)
    if tn is None:
        tn = auto_tn
    if tv is None:
        tv = auto_tv
    assert n % tn == 0 and v % tv == 0

    # Vocabulary lookup (label -> event token range) as plain-JAX gathers,
    # packed into one (N, 4) f32 sidecar; small_eps folded into the label col.
    lo = token_lo[labels].astype(jnp.float32)
    hi = token_hi[labels].astype(jnp.float32)
    inv_ub = 1.0 / (hi - lo + 1.0)
    labels_eps = labels.astype(jnp.float32) + small_eps
    side = jnp.stack([labels_eps, lo, hi, inv_ub], axis=1)        # (N, 4)

    # Precomputed token-index row (avoids per-step broadcasted_iota work).
    iota_row = jnp.arange(v, dtype=jnp.float32)[None, :]          # (1, V)

    loss_k = pl.pallas_call(
        _custom_loss_kernel,
        out_shape=jax.ShapeDtypeStruct((n, 1), jnp.float32),
        grid=(n // tn, v // tv),
        in_specs=[
            pl.BlockSpec((1, tv), lambda r, c: (0, c)),    # token indices
            pl.BlockSpec((tn, tv), lambda r, c: (r, c)),   # logits
            pl.BlockSpec((tn, 4), lambda r, c: (r, 0)),    # per-row scalars
        ],
        out_specs=pl.BlockSpec((tn, 1), lambda r, c: (r, 0)),
        scratch_shapes=[
            pltpu.VMEM((tn, 1), jnp.float32),   # running row max
            pltpu.VMEM((tn, 1), jnp.float32),   # running softmax denom
            pltpu.VMEM((tn, 1), jnp.float32),   # running fused masked sum
        ],
        compiler_params=pltpu.CompilerParams(
            dimension_semantics=("parallel", "arbitrary"),
            vmem_limit_bytes=vmem_limit_bytes,
        ),
    )(iota_row, logits, side)

    return jnp.mean(loss_k)


def _reference_loss(logits, labels, token_lo, token_hi, small_eps=SMALL_EPS):
    n, v = logits.shape
    lo = token_lo[labels].astype(jnp.int32)[:, None]
    hi = token_hi[labels].astype(jnp.int32)[:, None]
    ub = (hi - lo + 1).astype(jnp.float32)
    i = jnp.arange(v, dtype=jnp.int32)[None, :]
    mask_reg = (i >= lo) & (i <= hi)
    p = jax.nn.softmax(logits.astype(jnp.float32), axis=1)
    dist = jnp.abs(labels.astype(jnp.float32)[:, None]
                   - i.astype(jnp.float32) + small_eps)
    loss_reg = jnp.sum(jnp.where(mask_reg, dist * p, 0.0), axis=1, keepdims=True)
    loss_class = ub * jnp.sum(jnp.where(mask_reg, 0.0, p), axis=1, keepdims=True)
    return jnp.mean((loss_reg + loss_class) / ub)


if __name__ == "__main__":
    key = jax.random.PRNGKey(0)
    k1, k2 = jax.random.split(key)

    N = 256        # number of label positions
    V = 512        # vocab_size (multiple of 128)
    N_EVENTS = 4   # synthetic vocabulary: 4 event types, contiguous token ranges
    TOK_PER_EVENT = V // N_EVENTS

    # Deterministic synthetic Vocabulary: token id t belongs to event
    # t // TOK_PER_EVENT, whose range is [e*TOK_PER_EVENT, (e+1)*TOK_PER_EVENT-1].
    event_of_token = jnp.arange(V, dtype=jnp.int32) // TOK_PER_EVENT
    token_lo = event_of_token * TOK_PER_EVENT
    token_hi = token_lo + TOK_PER_EVENT - 1

    logits = jax.random.normal(k1, (N, V), dtype=jnp.float32)
    labels = jax.random.randint(k2, (N,), 0, V, dtype=jnp.int32)

    ref = _reference_loss(logits, labels, token_lo, token_hi)

    # f32 logits, auto tiles (single vocab chunk at this small V).
    loss = jax.block_until_ready(custom_loss(logits, labels, token_lo, token_hi))
    assert jnp.allclose(loss, ref, rtol=1e-5, atol=1e-6), (loss, ref)

    # Force vocab-axis tiling to exercise the online-softmax V loop.
    loss_vt = jax.block_until_ready(
        custom_loss(logits, labels, token_lo, token_hi, tn=64, tv=128))
    assert jnp.allclose(loss_vt, ref, rtol=1e-5, atol=1e-6), (loss_vt, ref)

    # bf16 logits (halves HBM traffic on mem-bound v5e; kernel math stays f32
    # except the packed-bf16 row max).
    logits_bf16 = logits.astype(jnp.bfloat16)
    loss_bf16 = jax.block_until_ready(
        custom_loss(logits_bf16, labels, token_lo, token_hi))
    ref_bf16 = _reference_loss(logits_bf16, labels, token_lo, token_hi)
    assert jnp.allclose(loss_bf16, ref_bf16, rtol=1e-5, atol=1e-5), (loss_bf16, ref_bf16)

    print("KERNEL_OK")
</pallas_src>

<mosaic_0001>
module attributes {stable_mosaic.version = 11 : i64} {
  func.func @_custom_loss_kernel(%arg0: i32, %arg1: i32, %arg2: memref<1x512xf32, #tpu.memory_space<vmem>>, %arg3: memref<64x512xf32, #tpu.memory_space<vmem>>, %arg4: memref<64x4xf32, #tpu.memory_space<vmem>>, %arg5: memref<64x1xf32, #tpu.memory_space<vmem>>, %arg6: memref<64x1xf32, #tpu.memory_space<vmem>>, %arg7: memref<64x1xf32, #tpu.memory_space<vmem>>, %arg8: memref<64x1xf32, #tpu.memory_space<vmem>>) attributes {dimension_semantics = [#tpu.dimension_semantics<parallel>, #tpu.dimension_semantics<arbitrary>], iteration_bounds = array<i64: 4, 1>, scalar_prefetch = 0 : i64, scratch_operands = 3 : i64, tpu.core_type = #tpu.core_type<tc>, window_params = [{transform_indices = @transform_0, window_bounds = array<i64: 1, 512>}, {transform_indices = @transform_1, window_bounds = array<i64: 64, 512>}, {transform_indices = @transform_2, window_bounds = array<i64: 64, 4>}, {transform_indices = @transform_3, window_bounds = array<i64: 64, 1>}]} {
    %c0_i32 = arith.constant 0 : i32
    %0 = arith.cmpi eq, %arg1, %c0_i32 : i32
    %1 = arith.extui %0 : i1 to i32
    %c0_i32_0 = arith.constant 0 : i32
    %2 = arith.cmpi ne, %1, %c0_i32_0 : i32
    scf.if %2 {
      %cst_24 = arith.constant 0xFF800000 : f32
      %53 = vector.broadcast %cst_24 : f32 to vector<64x1xf32>
      %c0_25 = arith.constant 0 : index
      %c0_26 = arith.constant 0 : index
      %54 = vector.load %arg6[%c0_25, %c0_26] : memref<64x1xf32, #tpu.memory_space<vmem>>, vector<64x1xf32>
      tpu.vector_store %arg6[%c0_25, %c0_26], %53 {strides = array<i32>} : memref<64x1xf32, #tpu.memory_space<vmem>>, vector<64x1xf32>,
      %cst_27 = arith.constant 0.000000e+00 : f32
      %55 = vector.broadcast %cst_27 : f32 to vector<64x1xf32>
      %c0_28 = arith.constant 0 : index
      %c0_29 = arith.constant 0 : index
      %56 = vector.load %arg7[%c0_28, %c0_29] : memref<64x1xf32, #tpu.memory_space<vmem>>, vector<64x1xf32>
      tpu.vector_store %arg7[%c0_28, %c0_29], %55 {strides = array<i32>} : memref<64x1xf32, #tpu.memory_space<vmem>>, vector<64x1xf32>,
      %cst_30 = arith.constant 0.000000e+00 : f32
      %57 = vector.broadcast %cst_30 : f32 to vector<64x1xf32>
      %c0_31 = arith.constant 0 : index
      %c0_32 = arith.constant 0 : index
      %58 = vector.load %arg8[%c0_31, %c0_32] : memref<64x1xf32, #tpu.memory_space<vmem>>, vector<64x1xf32>
      tpu.vector_store %arg8[%c0_31, %c0_32], %57 {strides = array<i32>} : memref<64x1xf32, #tpu.memory_space<vmem>>, vector<64x1xf32>,
    } else {
    }
    %c0 = arith.constant 0 : index
    %c0_1 = arith.constant 0 : index
    %3 = vector.load %arg3[%c0, %c0_1] : memref<64x512xf32, #tpu.memory_space<vmem>>, vector<64x512xf32>
    %cst = arith.constant dense<0xFF800000> : vector<64xf32>
    %4 = vector.multi_reduction <maximumf>, %3, %cst [1] : vector<64x512xf32> to vector<64xf32>
    %5 = vector.shape_cast %4 : vector<64xf32> to vector<64x1xf32>
    %c0_2 = arith.constant 0 : index
    %c0_3 = arith.constant 0 : index
    %6 = vector.load %arg4[%c0_2, %c0_3] : memref<64x4xf32, #tpu.memory_space<vmem>>, vector<64x4xf32>
    %7 = vector.extract_strided_slice %6 {offsets = [0, 0], sizes = [64, 1], strides = [1, 1]} : vector<64x4xf32> to vector<64x1xf32>
    %8 = vector.extract_strided_slice %6 {offsets = [0, 1], sizes = [64, 1], strides = [1, 1]} : vector<64x4xf32> to vector<64x1xf32>
    %9 = vector.extract_strided_slice %6 {offsets = [0, 2], sizes = [64, 1], strides = [1, 1]} : vector<64x4xf32> to vector<64x1xf32>
    %10 = vector.extract_strided_slice %6 {offsets = [0, 3], sizes = [64, 1], strides = [1, 1]} : vector<64x4xf32> to vector<64x1xf32>
    %c0_4 = arith.constant 0 : index
    %c0_5 = arith.constant 0 : index
    %11 = vector.load %arg2[%c0_4, %c0_5] : memref<1x512xf32, #tpu.memory_space<vmem>>, vector<1x512xf32>
    %c0_6 = arith.constant 0 : index
    %c0_7 = arith.constant 0 : index
    %12 = vector.load %arg6[%c0_6, %c0_7] : memref<64x1xf32, #tpu.memory_space<vmem>>, vector<64x1xf32>
    %13 = arith.maximumf %12, %5 : vector<64x1xf32>
    %14 = arith.subf %12, %13 : vector<64x1xf32>
    %15 = math.exp %14 : vector<64x1xf32>
    %16 = vector.broadcast %13 : vector<64x1xf32> to vector<64x512xf32>
    %17 = arith.subf %3, %16 : vector<64x512xf32>
    %18 = math.exp %17 : vector<64x512xf32>
    %19 = vector.broadcast %11 : vector<1x512xf32> to vector<64x512xf32>
    %20 = vector.broadcast %8 : vector<64x1xf32> to vector<64x512xf32>
    %21 = arith.cmpf oge, %19, %20 : vector<64x512xf32>
    %22 = vector.broadcast %11 : vector<1x512xf32> to vector<64x512xf32>
    %23 = vector.broadcast %9 : vector<64x1xf32> to vector<64x512xf32>
    %24 = arith.cmpf ole, %22, %23 : vector<64x512xf32>
    %25 = arith.andi %21, %24 : vector<64x512xi1>
    %26 = vector.broadcast %7 : vector<64x1xf32> to vector<64x512xf32>
    %27 = vector.broadcast %11 : vector<1x512xf32> to vector<64x512xf32>
    %28 = arith.subf %26, %27 : vector<64x512xf32>
    %29 = math.absf %28 : vector<64x512xf32>
    %30 = vector.broadcast %10 : vector<64x1xf32> to vector<64x512xf32>
    %31 = arith.mulf %29, %30 : vector<64x512xf32>
    %cst_8 = arith.constant 1.000000e+00 : f32
    %32 = vector.broadcast %cst_8 : f32 to vector<64x512xf32>
    %33 = arith.subf %31, %32 : vector<64x512xf32>
    %34 = arith.mulf %18, %33 : vector<64x512xf32>
    %cst_9 = arith.constant 0.000000e+00 : f32
    %35 = vector.broadcast %cst_9 : f32 to vector<64x512xf32>
    %36 = arith.select %25, %34, %35 : vector<64x512xi1>, vector<64x512xf32>
    %cst_10 = arith.constant dense<0.000000e+00> : vector<64xf32>
    %37 = vector.multi_reduction <add>, %36, %cst_10 [1] : vector<64x512xf32> to vector<64xf32>
    %38 = vector.shape_cast %37 : vector<64xf32> to vector<64x1xf32>
    %cst_11 = arith.constant dense<0.000000e+00> : vector<64xf32>
    %39 = vector.multi_reduction <add>, %18, %cst_11 [1] : vector<64x512xf32> to vector<64xf32>
    %40 = vector.shape_cast %39 : vector<64xf32> to vector<64x1xf32>
    %c0_12 = arith.constant 0 : index
    %c0_13 = arith.constant 0 : index
    %41 = vector.load %arg7[%c0_12, %c0_13] : memref<64x1xf32, #tpu.memory_space<vmem>>, vector<64x1xf32>
    %42 = arith.mulf %15, %41 : vector<64x1xf32>
    %43 = arith.addf %42, %40 : vector<64x1xf32>
    %c0_14 = arith.constant 0 : index
    %c0_15 = arith.constant 0 : index
    %44 = vector.load %arg7[%c0_14, %c0_15] : memref<64x1xf32, #tpu.memory_space<vmem>>, vector<64x1xf32>
    tpu.vector_store %arg7[%c0_14, %c0_15], %43 {strides = array<i32>} : memref<64x1xf32, #tpu.memory_space<vmem>>, vector<64x1xf32>,
    %c0_16 = arith.constant 0 : index
    %c0_17 = arith.constant 0 : index
    %45 = vector.load %arg8[%c0_16, %c0_17] : memref<64x1xf32, #tpu.memory_space<vmem>>, vector<64x1xf32>
    %46 = arith.mulf %15, %45 : vector<64x1xf32>
    %47 = arith.addf %46, %38 : vector<64x1xf32>
    %c0_18 = arith.constant 0 : index
    %c0_19 = arith.constant 0 : index
    %48 = vector.load %arg8[%c0_18, %c0_19] : memref<64x1xf32, #tpu.memory_space<vmem>>, vector<64x1xf32>
    tpu.vector_store %arg8[%c0_18, %c0_19], %47 {strides = array<i32>} : memref<64x1xf32, #tpu.memory_space<vmem>>, vector<64x1xf32>,
    %c0_20 = arith.constant 0 : index
    %c0_21 = arith.constant 0 : index
    %49 = vector.load %arg6[%c0_20, %c0_21] : memref<64x1xf32, #tpu.memory_space<vmem>>, vector<64x1xf32>
    tpu.vector_store %arg6[%c0_20, %c0_21], %13 {strides = array<i32>} : memref<64x1xf32, #tpu.memory_space<vmem>>, vector<64x1xf32>,
    %c0_i32_22 = arith.constant 0 : i32
    %50 = arith.cmpi eq, %arg1, %c0_i32_22 : i32
    %51 = arith.extui %50 : i1 to i32
    %c0_i32_23 = arith.constant 0 : i32
    %52 = arith.cmpi ne, %51, %c0_i32_23 : i32
    scf.if %52 {
      %c0_24 = arith.constant 0 : index
      %c0_25 = arith.constant 0 : index
      %53 = vector.load %arg8[%c0_24, %c0_25] : memref<64x1xf32, #tpu.memory_space<vmem>>, vector<64x1xf32>
      %c0_26 = arith.constant 0 : index
      %c0_27 = arith.constant 0 : index
      %54 = vector.load %arg7[%c0_26, %c0_27] : memref<64x1xf32, #tpu.memory_space<vmem>>, vector<64x1xf32>
      %55 = tpu.reciprocal %54 : vector<64x1xf32> -> vector<64x1xf32>
      %56 = arith.mulf %53, %55 : vector<64x1xf32>
      %cst_28 = arith.constant 1.000000e+00 : f32
      %57 = vector.broadcast %cst_28 : f32 to vector<64x1xf32>
      %58 = arith.addf %57, %56 : vector<64x1xf32>
      %c0_29 = arith.constant 0 : index
      %c0_30 = arith.constant 0 : index
      %59 = vector.load %arg5[%c0_29, %c0_30] : memref<64x1xf32, #tpu.memory_space<vmem>>, vector<64x1xf32>
      tpu.vector_store %arg5[%c0_29, %c0_30], %58 {strides = array<i32>} : memref<64x1xf32, #tpu.memory_space<vmem>>, vector<64x1xf32>,
    } else {
    }
    return
  }
  func.func @transform_0(%arg0: i32, %arg1: i32) -> (i32, i32) {
    %c0_i32 = arith.constant 0 : i32
    %c0_i32_0 = arith.constant 0 : i32
    return %c0_i32, %arg1 : i32, i32
  }
  func.func @transform_1(%arg0: i32, %arg1: i32) -> (i32, i32) {
    %c0_i32 = arith.constant 0 : i32
    return %arg0, %arg1 : i32, i32
  }
  func.func @transform_2(%arg0: i32, %arg1: i32) -> (i32, i32) {
    %c0_i32 = arith.constant 0 : i32
    %c0_i32_0 = arith.constant 0 : i32
    return %arg0, %c0_i32 : i32, i32
  }
  func.func @transform_3(%arg0: i32, %arg1: i32) -> (i32, i32) {
    %c0_i32 = arith.constant 0 : i32
    %c0_i32_0 = arith.constant 0 : i32
    return %arg0, %c0_i32 : i32, i32
  }
}

</mosaic_0001>

<bundles_post_ra>
// kernel: tpu_custom_call.1
= control target key start
LH: loop header
LB: loop body
LE: loop exit
PB: predicated region body
PF: predicated region fallthrough
CT: control target
= control target key end

     0   :  { %8 = vsyncpa [#allocation6], 0  ;;  %s3031_s0 = inlined_call_operand.vmem [shape: f32[1,512], index: 0, kind: input, shape index: {}]   ;;  %s3032_s1 = inlined_call_operand.hbm [shape: f32[256,512], index: 1, kind: input, shape index: {}]   ;;  %s3033_s2 = inlined_call_operand.vmem [shape: f32[256,4], index: 2, kind: input, shape index: {}]   ;;  %s3034_s3 = inlined_call_operand.vmem [shape: f32[256,1], index: 3, kind: output, shape index: {}]  }
   0x1   :  { %10 = vsyncpa [#allocation6 + $0x1], 0  ;;  %s1716_s12 = smov 0   ;;  %s1718_s13 = smov 0  }
   0x2   :  { %s1720_s14 = smov 0   ;;  %s1722_s15 = smov 0  }
   0x3   :  { %s1724_s16 = smov 0   ;;  %s1726_s17 = smov 0  }
   0x4 LB: > { %s1384_s18 = sadd.s32 4294967295, %s1686_s17   ;;  %s28_s19 = sadd.s32 1, %s1682_s16  ;;  %s1686_s17 = sphi %s1726_s17, %s16_s17   ;;  %s1682_s16 = sphi %s1724_s16, %s3343_s16   ;;  %s1678_s15 = sphi %s1722_s15, %s3342_s15   ;;  %s1674_s14 = sphi %s1720_s14, %s3341_s14   ;;  %s1670_s13 = sphi %s1718_s13, %s3340_s13   ;;  %s1666_s12 = sphi %s1716_s12, %s3339_s12  }
   0x5   : > { %p30_p0 = scmp.ge.s32.totalorder %s28_s19, 4  ;;  %s63_s20 = sadd.s32 1, %s1674_s14 }
   0x6   : > { %p70_p1 = scmp.ne.s32.totalorder %s1674_s14, %s1670_s13  ;;  %p71_p2 = scmp.eq.s32.totalorder %s1686_s17, 0 }
   0x7   : > { %s3345_s19 = smov (%p30_p0, %s28_s19), 0  ;;  %p76_p4 = scmp.ne.s32.totalorder %s1670_s13, %s1666_s12 }
   0x8   : > { %p1752_p3 = por %p71_p2, %p70_p1  ;;  %s58_s22 = ssub.s32 %s1682_s16, %s3345_s19 }
   0x9   : > { %p77_p5 = scmp.eq.s32.totalorder %s1384_s18, 0  ;;  %p61_p6 = scmp.eq.s32.totalorder %s58_s22, 0 }
   0xa   : > { %p1441_p8 = scmp.lt.s32.totalorder %s1686_s17, 4  ;;  %s160_s25 = sand.u32 1, %s1674_s14  }
   0xb   : > { %p1759_p7 = por %p77_p5, %p76_p4  ;;  %s1434_s26 = sshll.u32 %s1682_s16, 8 }
   0xc   : > { %s1765_s24 = scalar_select %p61_p6, %s1674_s14, %s63_s20  }
   0xd   : > { %s1389_s27 = sshll.u32 %s160_s25, 8  ;;  %s172_s30 = scalar_lea.hbm %s3032_s1, %s1434_s26 }
   0xe   : > { %s173_s4 = sshll.u32 %s172_s30, 4  ;;  %s164_s5 = scalar_lea.vmem [#allocation5], %s1389_s27  ;;  %s174_s4 = int_to_ptr.hbm [resolvable:$true] %s173_s4 }
   0xf   : > { %s175_s6 = sshll.u32 %s164_s5, 4  ;;  %p1438_p9 = pnand %p1441_p8, %p1752_p3  ;;  %s176_s6 = int_to_ptr.vmem [resolvable:$true] %s175_s6 }
  0x10   : > { %p1393_p10 = scmp.ge.s32.totalorder %s1686_s17, 1  ;;  %p192_p11 = scmp.lt.s32.totalorder %s1686_s17, 5 }
  0x11   : > { %s161_s7 = scalar_lea.sflag [#allocation6], %s160_s25  ;;  %s1688_s8 = smov 512  }
  0x12   : > { %s1689_s9 = smov 32   ;;  %p193_p12 = pnand %p1393_p10, %p192_p11 }
  0x13   : > { %1440 = dma.hbm_to_vmem [thread:$0]  (!%p1438_p9), %s174_s4, 4096, %s176_s6, %s161_s7, %s1688_s8, %s1688_s8, %s1689_s9  }
  0x14   : > { %196 = sbr.rel (%p193_p12) target bundleno = 483 (0x1e3), region = 32 }
  0x19   : > { %s198_s10 = sand.u32 1, %s1670_s13  }
  0x1a   : > { %s1394_s11 = sshll.u32 %s198_s10, 8  ;;  %s199_s12 = scalar_lea.sflag [#allocation6], %s198_s10 }
  0x1b   : > { %s1777_s18 = scalar_lea.vmem [#allocation5], %s1394_s11 }
  0x1c   : > { %1661 = dma.done.wait (%p1759_p7), %s199_s12, 4096  }
  0x1d   : > { %1663 = vsyncadd (%p1759_p7), %s199_s12, 4294963200  ;;  %v1690_v0 = vmov 1   ;;  %v1784_v1 = vld [vmem:[%s1777_s18 + $0x80] sm:$0xff]  ;;  %v1787_v2 = vld [vmem:[%s1777_s18 + $0x88] sm:$0xff]  ;;  %s1395_s20 = sshll.u32 %s1678_s15, 3  ;;  %vm3040_vm0 = vcmask 7168  }
  0x1e   : > { %1499 = vset.pattern.permute.xlu2 %v1690_v0  ;;  %1500 = vset.pattern.permute.xlu1 %v1690_v0  ;;  %v1790_v3 = vld [vmem:[%s1777_s18 + $0x90] sm:$0xff]  ;;  %v335_v4 = vmax.f32 %v1784_v1, %v1787_v2  ;;  %v1795_v5 = vld [vmem:[%s1777_s18 + $0x40] sm:$0xff]  ;;  %v1798_v6 = vld [vmem:[%s1777_s18 + $0x48] sm:$0xff]  ;;  %p243_p13 = scmp.lt.s32.totalorder %s1395_s20, 31 }
  0x1f   : > { %1498 = vset.pattern.permute.xlu0 %v1690_v0  ;;  %v1801_v7 = vld [vmem:[%s1777_s18 + $0x98] sm:$0xff]  ;;  %v1804_v8 = vld [vmem:[%s1777_s18 + $0x50] sm:$0xff]  ;;  %v325_v9 = vmax.f32 %v1795_v5, %v1798_v6  ;;  %v1809_v10 = vld [vmem:[%s1777_s18] sm:$0xff] }
  0x20   : > { %v336_v11 = vmax.f32 %v335_v4, %v1790_v3  ;;  %v1813_v12 = vld [vmem:[%s1777_s18 + $0x58] sm:$0xff]  ;;  %v1816_v13 = vld [vmem:[%s1777_s18 + $0x8] sm:$0xff]  ;;  %v1819_v14 = vld [vmem:[%s1777_s18 + $0x10] sm:$0xff]  ;;  %s3347_s20 = smov (!%p243_p13, %s1395_s20), 31  ;;  %v1691_v4 = vmov 2  }
  0x21   : > { %v326_v15 = vmax.f32 %v325_v9, %v1804_v8  ;;  %v315_v16 = vmax.f32 %v1809_v10, %v1816_v13  ;;  %v1825_v17 = vld [vmem:[%s1777_s18 + $0xa0] sm:$0xff]  ;;  %v1828_v18 = vld [vmem:[%s1777_s18 + $0xa8] sm:$0xff]  ;;  %v1831_v19 = vld [vmem:[%s1777_s18 + $0xb0] sm:$0xff]  ;;  %s1396_s21 = sshll.u32 %s3347_s20, 3  ;;  %v1692_v9 = vmov 0  }
  0x22   : > { %v337_v20 = vmax.f32 %v336_v11, %v1801_v7  ;;  %v1835_v21 = vld [vmem:[%s1777_s18 + $0x18] sm:$0xff]  ;;  %v340_v22 = vmax.f32 %v1825_v17, %v1828_v18  ;;  %v1840_v23 = vld [vmem:[%s1777_s18 + $0x60] sm:$0xff]  ;;  %v1843_v24 = vld [vmem:[%s1777_s18 + $0x68] sm:$0xff]  ;;  %s246_s25 = scalar_lea.vmem %s3033_s2, %s1396_s21  ;;  %v1693_v11 = vmov -inf   ;;  %s2898_s29 = scalar_lea.vmem %s3034_s3, %s1396_s21 }
  0x23   : > { %v327_v25 = vmax.f32 %v326_v15, %v1813_v12  ;;  %v316_v26 = vmax.f32 %v315_v16, %v1819_v14  ;;  %v1848_v27 = vld [vmem:[%s1777_s18 + $0x70] sm:$0xff]  ;;  %v330_v28 = vmax.f32 %v1840_v23, %v1843_v24  ;;  %v1853_v29 = vld [vmem:[%s1777_s18 + $0x20] sm:$0xff]  ;;  %v1857_v31 = vld [vmem:[%s1777_s18 + $0x28] sm:$0xff]  ;;  %263 = vst.msk [vmem:[#allocation2 + $0x20] sm:$0xff] %vm3040_vm0, %v1693_v11 }
  0x24   : > { %338 = vmax.xlane.f32.xlu2 %v337_v20  ;;  %v341_v30 = vmax.f32 %v340_v22, %v1831_v19  ;;  %v1860_v32 = vld [vmem:[%s1777_s18 + $0x30] sm:$0xff]  ;;  %v1864_v34 = vld [vmem:[%s1777_s18 + $0xb8] sm:$0xff]  ;;  %v320_v36 = vmax.f32 %v1853_v29, %v1857_v31  ;;  %v1873_v38 = vld [vmem:[%s1777_s18 + $0xe0] sm:$0xff]  ;;  %259 = vst.msk [vmem:[#allocation2] sm:$0xff] %vm3040_vm0, %v1693_v11 }
  0x25   : > { %328 = vmax.xlane.f32.xlu1 %v327_v25  ;;  %v317_v33 = vmax.f32 %v316_v26, %v1835_v21  ;;  %v331_v35 = vmax.f32 %v330_v28, %v1848_v27  ;;  %v1870_v37 = vld [vmem:[%s1777_s18 + $0x78] sm:$0xff]  ;;  %v1876_v39 = vld [vmem:[%s1777_s18 + $0xe8] sm:$0xff]  ;;  %v1884_v43 = vld [vmem:[%s1777_s18 + $0xc0] sm:$0xff]  ;;  %260 = vst.msk [vmem:[#allocation2 + $0x8] sm:$0xff] %vm3040_vm0, %v1693_v11 }
  0x26   : > { %v321_v40 = vmax.f32 %v320_v36, %v1860_v32  ;;  %v342_v41 = vmax.f32 %v341_v30, %v1864_v34  ;;  %v1881_v42 = vld [vmem:[%s1777_s18 + $0x38] sm:$0xff]  ;;  %v1887_v44 = vld [vmem:[%s1777_s18 + $0xc8] sm:$0xff]  ;;  %v350_v46 = vmax.f32 %v1873_v38, %v1876_v39  ;;  %v1893_v47 = vld [vmem:[%s1777_s18 + $0xf0] sm:$0xff]  ;;  %261 = vst.msk [vmem:[#allocation2 + $0x10] sm:$0xff] %vm3040_vm0, %v1693_v11 }
  0x27   : > { %318 = vmax.xlane.f32.xlu0 %v317_v33  ;;  %v332_v45 = vmax.f32 %v331_v35, %v1870_v37  ;;  %v345_v49 = vmax.f32 %v1884_v43, %v1887_v44  ;;  %v1899_v50 = vld [vmem:[%s1777_s18 + $0xd0] sm:$0xff]  ;;  %v1903_v52 = vld [vmem:[%s1777_s18 + $0xf8] sm:$0xff]  ;;  %v1920_v57 = vld [vmem:[%s246_s25 + $0x8] sm:$0xff]  ;;  %262 = vst.msk [vmem:[#allocation2 + $0x18] sm:$0xff] %vm3040_vm0, %v1693_v11 }
  0x28   : > { %v322_v48 = vmax.f32 %v321_v40, %v1881_v42  ;;  %v351_v51 = vmax.f32 %v350_v46, %v1893_v47  ;;  %v1907_v54 = vld [vmem:[%s1777_s18 + $0xd8] sm:$0xff]  ;;  %v1923_v58 = vld [vmem:[%s246_s25] sm:$0xff]  ;;  %v1927_v60 = vld [vmem:[%s246_s25 + $0x10] sm:$0xff]  ;;  %264 = vst.msk [vmem:[#allocation2 + $0x28] sm:$0xff] %vm3040_vm0, %v1693_v11  ;;  %v3105_v40 = vmov 0 }
  0x29   : > { %v346_v53 = vmax.f32 %v345_v49, %v1899_v50  ;;  %v1925_v59 = vld [vmem:[%s246_s25 + $0x18] sm:$0xff]  ;;  %v1932_v61 = vld [vmem:[%s246_s25 + $0x28] sm:$0xff]  ;;  %v1934_v62 = vld [vmem:[%s246_s25 + $0x30] sm:$0xff]  ;;  %265 = vst.msk [vmem:[#allocation2 + $0x30] sm:$0xff] %vm3040_vm0, %v1693_v11 }
  0x2a   : > { %v352_v55 = vmax.f32 %v351_v51, %v1903_v52  ;;  %v1936_v63 = vld [vmem:[%s246_s25 + $0x20] sm:$0xff]  ;;  %v1941_v0 = vld [vmem:[%s246_s25 + $0x38] sm:$0xff]  ;;  %266 = vst.msk [vmem:[#allocation2 + $0x38] sm:$0xff] %vm3040_vm0, %v1693_v11 }
  0x2b   : > { %v347_v56 = vmax.f32 %v346_v53, %v1907_v54  ;;  %v1968_v15 = vld [vmem:[#allocation2 + $0x20] sm:$0xff]  ;;  %v1694_v53 = vmov 0.0  }
  0x2c   : > { %343 = vmax.xlane.f32.xlu2 %v342_v41  ;;  %3089 = vst [vmem:[#allocation8_spill] sm:$0xff] %v1968_v15  ;;  %v1975_v26 = vld [vmem:[#allocation2] sm:$0xff]  ;;  %v2004_v51 = vld [vmem:[#allocation2 + $0x8] sm:$0xff] }
  0x2d   : > { %333 = vmax.xlane.f32.xlu1 %v332_v45  ;;  %v1970_v16 = vld [vmem:[#allocation2 + $0x10] sm:$0xff]  ;;  %3092 = vst [vmem:[#allocation11_spill] sm:$0xff] %v1975_v26 }
  0x2e   : > { %3090 = vst [vmem:[#allocation9_spill] sm:$0xff] %v1970_v16  ;;  %v1999_v45 = vld [vmem:[#allocation2 + $0x18] sm:$0xff] }
  0x2f   : > { %323 = vmax.xlane.f32.xlu0 %v322_v48  ;;  %v1997_v41 = vld [vmem:[#allocation2 + $0x28] sm:$0xff]  ;;  %3096 = vst [vmem:[#allocation15_spill] sm:$0xff] %v1999_v45 }
  0x30   : > { %3095 = vst [vmem:[#allocation14_spill] sm:$0xff] %v1997_v41 }
  0x31   : > { %3098 = vst [vmem:[#allocation17_spill] sm:$0xff] %v2004_v51 }
  0x32   : > { %267 = vst.msk [vmem:[#allocation3] sm:$0xff] %vm3040_vm0, %v1694_v53 }
  0x33   : > { %268 = vst.msk [vmem:[#allocation3 + $0x8] sm:$0xff] %vm3040_vm0, %v1694_v53 }
  0x34   : > { %269 = vst.msk [vmem:[#allocation3 + $0x10] sm:$0xff] %vm3040_vm0, %v1694_v53 }
  0x35   : > { %353 = vmax.xlane.f32.xlu1 %v352_v55  ;;  %270 = vst.msk [vmem:[#allocation3 + $0x18] sm:$0xff] %vm3040_vm0, %v1694_v53 }
  0x36   : > { %271 = vst.msk [vmem:[#allocation3 + $0x20] sm:$0xff] %vm3040_vm0, %v1694_v53 }
  0x37   : > { %348 = vmax.xlane.f32.xlu0 %v347_v56  ;;  %272 = vst.msk [vmem:[#allocation3 + $0x28] sm:$0xff] %vm3040_vm0, %v1694_v53 }
  0x38   : > { %273 = vst.msk [vmem:[#allocation3 + $0x30] sm:$0xff] %vm3040_vm0, %v1694_v53 }
  0x39   : > { %274 = vst.msk [vmem:[#allocation3 + $0x38] sm:$0xff] %vm3040_vm0, %v1694_v53 }
  0x3a   : > { %275 = vst.msk [vmem:[#allocation4] sm:$0xff] %vm3040_vm0, %v1694_v53 }
  0x3b   : > { %276 = vst.msk [vmem:[#allocation4 + $0x8] sm:$0xff] %vm3040_vm0, %v1694_v53 }
  0x3c   : > { %277 = vst.msk [vmem:[#allocation4 + $0x10] sm:$0xff] %vm3040_vm0, %v1694_v53 }
  0x3d   : > { %278 = vst.msk [vmem:[#allocation4 + $0x18] sm:$0xff] %vm3040_vm0, %v1694_v53 }
  0x3e   : > { %279 = vst.msk [vmem:[#allocation4 + $0x20] sm:$0xff] %vm3040_vm0, %v1694_v53 }
  0x3f   : > { %280 = vst.msk [vmem:[#allocation4 + $0x28] sm:$0xff] %vm3040_vm0, %v1694_v53 }
  0x40   : > { %281 = vst.msk [vmem:[#allocation4 + $0x30] sm:$0xff] %vm3040_vm0, %v1694_v53 }
  0x41   : > { %282 = vst.msk [vmem:[#allocation4 + $0x38] sm:$0xff] %vm3040_vm0, %v1694_v53 }
  0x44   : > { %556 = vperm.xlu2 %1499, %v1920_v57  }
  0x4b   : > { %551 = vperm.xlu0 %1498, %v1923_v58  }
  0x4c   : > { %566 = vperm.xlu2 %1499, %v1925_v59  }
  0x4e   : > { %561 = vperm.xlu1 %1500, %v1927_v60  }
  0x53   : > { %576 = vperm.xlu0 %1498, %v1932_v61  }
  0x54   : > { %581 = vperm.xlu2 %1499, %v1934_v62  }
  0x56   : > { %571 = vperm.xlu1 %1500, %v1936_v63  }
  0x5b   : > { %1501 = vset.pattern.permute.xlu0 %v1691_v4 }
  0x5c   : > { %1502 = vset.pattern.permute.xlu2 %v1691_v4  ;;  %622 = vperm.xlu0 %1501, %v1923_v58  }
  0x5d   : > { %626 = vperm.xlu2 %1502, %v1920_v57  }
  0x5e   : > { %586 = vperm.xlu1 %1500, %v1941_v0  }
  0x64   : > { %642 = vperm.xlu0 %1501, %v1932_v61  }
  0x65   : > { %634 = vperm.xlu2 %1502, %v1925_v59  }
  0x66   : > { %1503 = vset.pattern.permute.xlu1 %v1691_v4 }
  0x67   : > { %630 = vperm.xlu1 %1503, %v1927_v60  }
  0x6c   : > { %1504 = vset.pattern.permute.xlu0 %v1692_v9 }
  0x6d   : > { %646 = vperm.xlu2 %1502, %v1934_v62   ;;  %718 = vperm.xlu0 %1504, %v1923_v58  }
  0x6f   : > { %638 = vperm.xlu1 %1503, %v1936_v63  }
  0x75   : > { %1505 = vset.pattern.permute.xlu2 %v1692_v9  ;;  %738 = vperm.xlu0 %1504, %v1932_v61  }
  0x76   : > { %722 = vperm.xlu2 %1505, %v1920_v57  }
  0x77   : > { %650 = vperm.xlu1 %1503, %v1941_v0  }
  0x7e   : > { %730 = vperm.xlu2 %1505, %v1925_v59  }
  0x7f   : > { %1506 = vset.pattern.permute.xlu1 %v1692_v9 }
  0x80   : > { %726 = vperm.xlu1 %1506, %v1927_v60  }
  0x86   : > { %742 = vperm.xlu2 %1505, %v1934_v62  }
  0x88   : > { %734 = vperm.xlu1 %1506, %v1936_v63  }
  0x90   : > { %746 = vperm.xlu1 %1506, %v1941_v0  }
  0x97   : > { %v339_v20 = vpop.xlane.xlu2 %338 }
  0x98   : > { %v1973_v22 = vmax.f32 %v1968_v15, %v339_v20  ;;  %v329_v25 = vpop.xlane.xlu1 %328  ;;  %v3159_v15 = vmov 0 }
  0x99   : > { %v1978_v28 = vmax.f32 %v1970_v16, %v329_v25  ;;  %v2030_v25 = vld [vmem:[#allocation2 + $0x38] sm:$0xff] }
  0x9a   : > { %3091 = vst [vmem:[#allocation10_spill] sm:$0xff] %v1973_v22  ;;  %v319_v33 = vpop.xlane.xlu0 %318 }
  0x9b   : > { %3093 = vst [vmem:[#allocation12_spill] sm:$0xff] %v1978_v28  ;;  %v1989_v36 = vmax.f32 %v1975_v26, %v319_v33  ;;  %416 = vperm.xlu1 %1506, %v1978_v28   ;;  %v3165_v26 = vmov 0 }
  0x9c   : > { %1122 = vst.msk [vmem:[#allocation2 + $0x20] sm:$0xff] %vm3040_vm0, %v1973_v22 }
  0x9d   : > { %1120 = vst.msk [vmem:[#allocation2 + $0x10] sm:$0xff] %vm3040_vm0, %v1978_v28  ;;  %406 = vperm.xlu2 %1505, %v1989_v36   ;;  %v3152_v28 = vmov 0 }
  0x9e   : > { %3094 = vst [vmem:[#allocation13_spill] sm:$0xff] %v1989_v36 }
  0x9f   : > { %1118 = vst.msk [vmem:[#allocation2] sm:$0xff] %vm3040_vm0, %v1989_v36  ;;  %v344_v46 = vpop.xlane.xlu2 %343  ;;  %v3162_v36 = vmov 0 }
  0xa0   : > { %v2002_v48 = vmax.f32 %v1997_v41, %v344_v46  ;;  %v334_v49 = vpop.xlane.xlu1 %333  ;;  %3101 = vst [vmem:[#allocation20_spill] sm:$0xff] %v2030_v25  ;;  %v3149_v41 = vmov 0 }
  0xa1   : > { %v2008_v55 = vmax.f32 %v1999_v45, %v334_v49  ;;  %v2034_v49 = vld [vmem:[#allocation2 + $0x30] sm:$0xff] }
  0xa2   : > { %3097 = vst [vmem:[#allocation16_spill] sm:$0xff] %v2002_v48  ;;  %v324_v4 = vpop.xlane.xlu0 %323 }
  0xa3   : > { %3099 = vst [vmem:[#allocation18_spill] sm:$0xff] %v2008_v55  ;;  %v2020_v11 = vmax.f32 %v2004_v51, %v324_v4  ;;  %431 = vperm.xlu1 %1506, %v2002_v48  }
  0xa4   : > { %1123 = vst.msk [vmem:[#allocation2 + $0x28] sm:$0xff] %vm3040_vm0, %v2002_v48 }
  0xa5   : > { %1121 = vst.msk [vmem:[#allocation2 + $0x18] sm:$0xff] %vm3040_vm0, %v2008_v55  ;;  %411 = vperm.xlu0 %1504, %v2020_v11   ;;  %421 = vperm.xlu2 %1505, %v2008_v55   ;;  %v3127_v55 = vmov 0 }
  0xa6   : > { %3100 = vst [vmem:[#allocation19_spill] sm:$0xff] %v2020_v11 }
  0xa7   : > { %1119 = vst.msk [vmem:[#allocation2 + $0x8] sm:$0xff] %vm3040_vm0, %v2020_v11  ;;  %v557_v33 = vpop.permute.xlu2 %556  ;;  %v3140_v11 = vmov 0 }
  0xa8   : > { %v354_v46 = vpop.xlane.xlu1 %353  ;;  %3102 = vst [vmem:[#allocation21_spill] sm:$0xff] %v2034_v49 }
  0xa9   : > { %v2038_v4 = vmax.f32 %v2030_v25, %v354_v46  ;;  %v1695_v46 = vmov 3  }
  0xaa   : > { %v349_v9 = vpop.xlane.xlu0 %348 }
  0xab   : > { %3103 = vst [vmem:[#allocation22_spill] sm:$0xff] %v2038_v4  ;;  %441 = vperm.xlu1 %1506, %v2038_v4   ;;  %v2048_v56 = vmax.f32 %v2034_v49, %v349_v9 }
  0xac   : > { %1125 = vst.msk [vmem:[#allocation2 + $0x38] sm:$0xff] %vm3040_vm0, %v2038_v4  ;;  %v3133_v4 = vmov 0 }
  0xad   : > { %3104 = vst [vmem:[#allocation23_spill] sm:$0xff] %v2048_v56  ;;  %1507 = vset.pattern.permute.xlu0 %v1695_v46  ;;  %426 = vperm.xlu2 %1505, %v1973_v22  }
  0xae   : > { %1124 = vst.msk [vmem:[#allocation2 + $0x30] sm:$0xff] %vm3040_vm0, %v2048_v56  ;;  %814 = vperm.xlu0 %1507, %v1923_v58   ;;  %v363_v58 = vld [vmem:[%s3031_s0] sm:$0xf] }
  0xaf   : > { %v567_v20 = vpop.permute.xlu2 %566  ;;  %v2070_v35 = vperm.slane %v363_v58, 0  ;;  %v2072_v30 = vperm.slane %v363_v58, 1 }
  0xb1   : > { %vm593_vm1 = vcmp.ge.f32.partialorder %v2070_v35, %v557_v33  ;;  %vm594_vm2 = vcmp.ge.f32.partialorder %v2072_v30, %v557_v33  ;;  %vm601_vm12 = vcmp.ge.f32.partialorder %v2070_v35, %v567_v20 }
  0xb3   : > { %1509 = vset.pattern.permute.xlu1 %v1695_v46 }
  0xb4   : > { %822 = vperm.xlu1 %1509, %v1927_v60  }
  0xb5   : > { %436 = vperm.xlu2 %1505, %v2048_v56   ;;  %v3111_v56 = vmov 0 }
  0xb6   : > { %834 = vperm.xlu0 %1507, %v1932_v61   ;;  %v2078_v61 = vperm.slane %v363_v58, 2 }
  0xb7   : > { %v582_v9 = vpop.permute.xlu2 %581 }
  0xb8   : > { %vm595_vm7 = vcmp.ge.f32.partialorder %v2078_v61, %v557_v33 }
  0xbc   : > { %830 = vperm.xlu1 %1509, %v1936_v63   ;;  %v3108_v63 = vmov 0 }
  0xbd   : > { %1508 = vset.pattern.permute.xlu2 %v1695_v46  ;;  %v2090_v46 = vperm.slane %v363_v58, 3  ;;  %v2126_v49 = vpop.permute.xlu0 %551 }
  0xbe   : > { %818 = vperm.xlu2 %1508, %v1920_v57   ;;  %3126 = vst [vmem:[#allocation31_spill] sm:$0xff] %v2126_v49 }
  0xbf   : > { %v627_v60 = vpop.permute.xlu2 %626  ;;  %vm596_vm9 = vcmp.ge.f32.partialorder %v2090_v46, %v557_v33  ;;  %v3120_v33 = vmov 0 }
  0xc0   : > { %vm657_vm3 = vcmp.le.f32.partialorder %v2070_v35, %v627_v60  ;;  %vm658_vm4 = vcmp.le.f32.partialorder %v2072_v30, %v627_v60  ;;  %v562_v53 = vpop.permute.xlu1 %561  ;;  %vm659_vm8 = vcmp.le.f32.partialorder %v2078_v61, %v627_v60  ;;  %vm660_vm10 = vcmp.le.f32.partialorder %v2090_v46, %v627_v60 }
  0xc1   : > { %vm2082_vm5 = vmand %vm593_vm1, %vm657_vm3  ;;  %vm602_vm1 = vcmp.ge.f32.partialorder %v2072_v30, %v567_v20  ;;  %v3123_v60 = vmov 0 }
  0xc2   : > { %v3106_v40 = vsel %vm2082_vm5, 4294967295, %v3105_v40  ;;  %vm2086_vm6 = vmand %vm594_vm2, %vm658_vm4 }
  0xc3   : > { %3107 = vst [vmem:[#allocation24_spill] sm:$0xff] %v3106_v40  ;;  %v3109_v63 = vsel %vm2086_vm6, 4294967295, %v3108_v63  ;;  %vm2098_vm11 = vmand %vm595_vm7, %vm659_vm8  ;;  %vm603_vm7 = vcmp.ge.f32.partialorder %v2078_v61, %v567_v20 }
  0xc4   : > { %3110 = vst [vmem:[#allocation25_spill] sm:$0xff] %v3109_v63  ;;  %842 = vperm.xlu1 %1509, %v1941_v0   ;;  %v3112_v56 = vsel %vm2098_vm11, 4294967295, %v3111_v56  ;;  %vm2105_vm15 = vmand %vm596_vm9, %vm660_vm10  ;;  %v3114_v0 = vmov 0  ;;  %vm604_vm9 = vcmp.ge.f32.partialorder %v2090_v46, %v567_v20  ;;  %vm616_vm11 = vcmp.ge.f32.partialorder %v2090_v46, %v582_v9 }
  0xc5   : > { %3113 = vst [vmem:[#allocation26_spill] sm:$0xff] %v3112_v56  ;;  %v3115_v0 = vsel %vm2105_vm15, 4294967295, %v3114_v0  ;;  %vm615_vm15 = vcmp.ge.f32.partialorder %v2078_v61, %v582_v9  ;;  %v2153_v25 = vpop.permute.xlu0 %576 }
  0xc6   : > { %826 = vperm.xlu2 %1508, %v1925_v59   ;;  %3116 = vst [vmem:[#allocation27_spill] sm:$0xff] %v3115_v0  ;;  %v3117_v59 = vmov 0 }
  0xc7   : > { %v635_v57 = vpop.permute.xlu2 %634  ;;  %3139 = vst [vmem:[#allocation36_spill] sm:$0xff] %v2153_v25 }
  0xc8   : > { %vm665_vm13 = vcmp.le.f32.partialorder %v2070_v35, %v635_v57  ;;  %vm666_vm14 = vcmp.le.f32.partialorder %v2072_v30, %v635_v57  ;;  %v572_v58 = vpop.permute.xlu1 %571  ;;  %vm667_vm2 = vcmp.le.f32.partialorder %v2078_v61, %v635_v57  ;;  %vm668_vm8 = vcmp.le.f32.partialorder %v2090_v46, %v635_v57 }
  0xc9   : > { %vm2111_vm3 = vmand %vm601_vm12, %vm665_vm13  ;;  %vm613_vm13 = vcmp.ge.f32.partialorder %v2070_v35, %v582_v9  ;;  %v3130_v57 = vmov 0 }
  0xca   : > { %v3118_v59 = vsel %vm2111_vm3, 4294967295, %v3117_v59  ;;  %vm2115_vm4 = vmand %vm602_vm1, %vm666_vm14 }
  0xcb   : > { %3119 = vst [vmem:[#allocation28_spill] sm:$0xff] %v3118_v59  ;;  %v3121_v33 = vsel %vm2115_vm4, 4294967295, %v3120_v33  ;;  %vm2122_vm10 = vmand %vm603_vm7, %vm667_vm2  ;;  %vm614_vm2 = vcmp.ge.f32.partialorder %v2072_v30, %v582_v9  ;;  %v3146_v9 = vmov 0 }
  0xcc   : > { %3122 = vst [vmem:[#allocation29_spill] sm:$0xff] %v3121_v33  ;;  %v3124_v60 = vsel %vm2122_vm10, 4294967295, %v3123_v60  ;;  %vm2128_vm12 = vmand %vm604_vm9, %vm668_vm8  ;;  %vm608_vm10 = vcmp.ge.f32.partialorder %v2090_v46, %v572_v58 }
  0xcd   : > { %3125 = vst [vmem:[#allocation30_spill] sm:$0xff] %v3124_v60  ;;  %v3128_v55 = vsel %vm2128_vm12, 4294967295, %v3127_v55 }
  0xce   : > { %3129 = vst [vmem:[#allocation32_spill] sm:$0xff] %v3128_v55  ;;  %838 = vperm.xlu2 %1508, %v1934_v62   ;;  %v3136_v62 = vmov 0  ;;  %v2185_v16 = vpop.permute.xlu0 %622 }
  0xcf   : > { %v647_v45 = vpop.permute.xlu2 %646  ;;  %3155 = vst [vmem:[#allocation42_spill] sm:$0xff] %v2185_v16 }
  0xd0   : > { %vm677_vm14 = vcmp.le.f32.partialorder %v2070_v35, %v647_v45  ;;  %vm678_vm1 = vcmp.le.f32.partialorder %v2072_v30, %v647_v45  ;;  %v587_v20 = vpop.permute.xlu1 %586  ;;  %vm679_vm9 = vcmp.le.f32.partialorder %v2078_v61, %v647_v45  ;;  %vm680_vm0 = vcmp.le.f32.partialorder %v2090_v46, %v647_v45 }
  0xd1   : > { %vm2137_vm7 = vmand %vm613_vm13, %vm677_vm14  ;;  %vm597_vm14 = vcmp.ge.f32.partialorder %v2070_v35, %v562_v53  ;;  %v3143_v45 = vmov 0 }
  0xd2   : > { %v3131_v57 = vsel %vm2137_vm7, 4294967295, %v3130_v57  ;;  %vm2141_vm8 = vmand %vm614_vm2, %vm678_vm1 }
  0xd3   : > { %3132 = vst [vmem:[#allocation33_spill] sm:$0xff] %v3131_v57  ;;  %v3134_v4 = vsel %vm2141_vm8, 4294967295, %v3133_v4  ;;  %vm2149_vm6 = vmand %vm615_vm15, %vm679_vm9  ;;  %vm598_vm9 = vcmp.ge.f32.partialorder %v2072_v30, %v562_v53  ;;  %vm600_vm8 = vcmp.ge.f32.partialorder %v2090_v46, %v562_v53 }
  0xd4   : > { %3135 = vst [vmem:[#allocation34_spill] sm:$0xff] %v3134_v4  ;;  %v3137_v62 = vsel %vm2149_vm6, 4294967295, %v3136_v62  ;;  %vm2155_vm13 = vmand %vm616_vm11, %vm680_vm0  ;;  %vm599_vm11 = vcmp.ge.f32.partialorder %v2078_v61, %v562_v53 }
  0xd5   : > { %3138 = vst [vmem:[#allocation35_spill] sm:$0xff] %v3137_v62  ;;  %v3141_v11 = vsel %vm2155_vm13, 4294967295, %v3140_v11 }
  0xd6   : > { %3142 = vst [vmem:[#allocation37_spill] sm:$0xff] %v3141_v11  ;;  %v3178_v11 = vmov 0 }
  0xd7   : > { %v2159_v48 = vpop.permute.xlu2 %722 }
  0xd8   : > { %v753_v62 = vsub.f32 %v2159_v48, %v2070_v35  ;;  %v756_v4 = vsub.f32 %v2159_v48, %v2090_v46 }
  0xd9   : > { %v631_v51 = vpop.permute.xlu1 %630 }
  0xda   : > { %vm661_vm1 = vcmp.le.f32.partialorder %v2070_v35, %v631_v51  ;;  %vm662_vm2 = vcmp.le.f32.partialorder %v2072_v30, %v631_v51  ;;  %vm663_vm15 = vcmp.le.f32.partialorder %v2078_v61, %v631_v51  ;;  %vm664_vm0 = vcmp.le.f32.partialorder %v2090_v46, %v631_v51 }
  0xdb   : > { %vm2166_vm6 = vmand %vm597_vm14, %vm661_vm1  ;;  %vm605_vm14 = vcmp.ge.f32.partialorder %v2070_v35, %v572_v58  ;;  %v3156_v51 = vmov 0 }
  0xdc   : > { %v3144_v45 = vsel %vm2166_vm6, 4294967295, %v3143_v45  ;;  %vm2172_vm13 = vmand %vm598_vm9, %vm662_vm2 }
  0xdd   : > { %3145 = vst [vmem:[#allocation38_spill] sm:$0xff] %v3144_v45  ;;  %v3147_v9 = vsel %vm2172_vm13, 4294967295, %v3146_v9  ;;  %vm2177_vm7 = vmand %vm599_vm11, %vm663_vm15  ;;  %vm606_vm15 = vcmp.ge.f32.partialorder %v2072_v30, %v572_v58 }
  0xde   : > { %3148 = vst [vmem:[#allocation39_spill] sm:$0xff] %v3147_v9  ;;  %v3150_v41 = vsel %vm2177_vm7, 4294967295, %v3149_v41  ;;  %vm2181_vm5 = vmand %vm600_vm8, %vm664_vm0  ;;  %vm607_vm8 = vcmp.ge.f32.partialorder %v2078_v61, %v572_v58  ;;  %v3169_v58 = vmov 0  ;;  %v2268_v9 = vand.u32 2147483647, %v756_v4 }
  0xdf   : > { %3151 = vst [vmem:[#allocation40_spill] sm:$0xff] %v3150_v41  ;;  %v3153_v28 = vsel %vm2181_vm5, 4294967295, %v3152_v28  ;;  %v731_v53 = vpop.permute.xlu2 %730 }
  0xe0   : > { %3154 = vst [vmem:[#allocation41_spill] sm:$0xff] %v3153_v28  ;;  %v762_v55 = vsub.f32 %v731_v53, %v2072_v30  ;;  %v763_v60 = vsub.f32 %v731_v53, %v2078_v61  ;;  %v764_v33 = vsub.f32 %v731_v53, %v2090_v46 }
  0xe1   : > { %v639_v22 = vpop.permute.xlu1 %638 }
  0xe2   : > { %vm669_vm1 = vcmp.le.f32.partialorder %v2070_v35, %v639_v22  ;;  %vm670_vm2 = vcmp.le.f32.partialorder %v2072_v30, %v639_v22  ;;  %vm671_vm9 = vcmp.le.f32.partialorder %v2078_v61, %v639_v22  ;;  %vm672_vm12 = vcmp.le.f32.partialorder %v2090_v46, %v639_v22  ;;  %v2216_v22 = vpop.permute.xlu0 %642 }
  0xe3   : > { %vm2192_vm11 = vmand %vm605_vm14, %vm669_vm1  ;;  %vm617_vm14 = vcmp.ge.f32.partialorder %v2070_v35, %v587_v20  ;;  %3168 = vst [vmem:[#allocation47_spill] sm:$0xff] %v2216_v22 }
  0xe4   : > { %v3157_v51 = vsel %vm2192_vm11, 4294967295, %v3156_v51  ;;  %vm2197_vm0 = vmand %vm606_vm15, %vm670_vm2 }
  0xe5   : > { %3158 = vst [vmem:[#allocation43_spill] sm:$0xff] %v3157_v51  ;;  %v3160_v15 = vsel %vm2197_vm0, 4294967295, %v3159_v15  ;;  %vm2203_vm4 = vmand %vm607_vm8, %vm671_vm9  ;;  %vm618_vm0 = vcmp.ge.f32.partialorder %v2072_v30, %v587_v20 }
  0xe6   : > { %3161 = vst [vmem:[#allocation44_spill] sm:$0xff] %v3160_v15  ;;  %v3163_v36 = vsel %vm2203_vm4, 4294967295, %v3162_v36  ;;  %vm2207_vm3 = vmand %vm608_vm10, %vm672_vm12  ;;  %vm619_vm10 = vcmp.ge.f32.partialorder %v2078_v61, %v587_v20  ;;  %v3175_v15 = vmov 0 }
  0xe7   : > { %3164 = vst [vmem:[#allocation45_spill] sm:$0xff] %v3163_v36  ;;  %v3166_v26 = vsel %vm2207_vm3, 4294967295, %v3165_v26  ;;  %v2228_v36 = vpop.permute.xlu2 %742  ;;  %vm620_vm3 = vcmp.ge.f32.partialorder %v2090_v46, %v587_v20  ;;  %v755_v20 = vsub.f32 %v2159_v48, %v2078_v61 }
  0xe8   : > { %3167 = vst [vmem:[#allocation46_spill] sm:$0xff] %v3166_v26  ;;  %v3172_v26 = vmov 0  ;;  %v774_v4 = vsub.f32 %v2228_v36, %v2072_v30 }
  0xe9   : > { %v651_v51 = vpop.permute.xlu1 %650  ;;  %v2262_v41 = vand.u32 2147483647, %v755_v20 }
  0xea   : > { %vm681_vm1 = vcmp.le.f32.partialorder %v2070_v35, %v651_v51  ;;  %vm682_vm2 = vcmp.le.f32.partialorder %v2072_v30, %v651_v51  ;;  %vm683_vm15 = vcmp.le.f32.partialorder %v2078_v61, %v651_v51  ;;  %vm684_vm8 = vcmp.le.f32.partialorder %v2090_v46, %v651_v51 }
  0xeb   : > { %vm2218_vm9 = vmand %vm617_vm14, %vm681_vm1  ;;  %v754_v51 = vsub.f32 %v2159_v48, %v2072_v30  ;;  %v2305_v49 = vand.u32 2147483647, %v774_v4 }
  0xec   : > { %v3170_v58 = vsel %vm2218_vm9, 4294967295, %v3169_v58  ;;  %vm2223_vm12 = vmand %vm618_vm0, %vm682_vm2 }
  0xed   : > { %3171 = vst [vmem:[#allocation48_spill] sm:$0xff] %v3170_v58  ;;  %v3173_v26 = vsel %vm2223_vm12, 4294967295, %v3172_v26  ;;  %vm2231_vm4 = vmand %vm619_vm10, %vm683_vm15  ;;  %v2255_v40 = vand.u32 2147483647, %v754_v51 }
  0xee   : > { %3174 = vst [vmem:[#allocation49_spill] sm:$0xff] %v3173_v26  ;;  %v3176_v15 = vsel %vm2231_vm4, 4294967295, %v3175_v15  ;;  %vm2235_vm14 = vmand %vm620_vm3, %vm684_vm8  ;;  %v719_v26 = vpop.permute.xlu0 %718 }
  0xef   : > { %3177 = vst [vmem:[#allocation50_spill] sm:$0xff] %v3176_v15  ;;  %v3179_v11 = vsel %vm2235_vm14, 4294967295, %v3178_v11  ;;  %v2249_v15 = vand.u32 2147483647, %v753_v62  ;;  %v749_v28 = vsub.f32 %v719_v26, %v2070_v35  ;;  %v751_v51 = vsub.f32 %v719_v26, %v2078_v61 }
  0xf0   : > { %3180 = vst [vmem:[#allocation51_spill] sm:$0xff] %v3179_v11  ;;  %v761_v11 = vsub.f32 %v731_v53, %v2070_v35  ;;  %v773_v53 = vsub.f32 %v2228_v36, %v2070_v35 }
  0xf1   : > { %3185 = vst [vmem:[#allocation56_spill] sm:$0xff] %v2305_v49 }
  0xf2   : > { %v2239_v58 = vpop.permute.xlu1 %726  ;;  %v2270_v45 = vand.u32 2147483647, %v761_v11  ;;  %v2283_v11 = vand.u32 2147483647, %v749_v28  ;;  %v2303_v16 = vand.u32 2147483647, %v773_v53 }
  0xf4   : > { %3184 = vst [vmem:[#allocation55_spill] sm:$0xff] %v2303_v16 }
  0xf7   : > { %v407_v57 = vpop.permute.xlu2 %406 }
  0xf8   : > { %v444_v0 = vsub.f32 %v1809_v10, %v407_v57  ;;  %v445_v56 = vsub.f32 %v1816_v13, %v407_v57  ;;  %v446_v63 = vsub.f32 %v1819_v14, %v407_v57  ;;  %v447_v48 = vsub.f32 %v1835_v21, %v407_v57 }
  0xf9   : > { %v750_v14 = vsub.f32 %v719_v26, %v2072_v30  ;;  %v752_v21 = vsub.f32 %v719_v26, %v2090_v46  ;;  %v2277_v57 = vand.u32 2147483647, %v764_v33  ;;  %v775_v26 = vsub.f32 %v2228_v36, %v2078_v61 }
  0xfa   : > { %v476_v62 = vmul.f32 1.442695, %v444_v0  ;;  %v478_v59 = vmul.f32 1.442695, %v445_v56  ;;  %v480_v10 = vmul.f32 1.442695, %v446_v63  ;;  %v2264_v13 = vpop.permute.xlu1 %734  ;;  %v739_v63 = vpop.permute.xlu0 %738 }
  0xfb   : > { %v2273_v0 = vand.u32 2147483647, %v762_v55  ;;  %v2275_v56 = vand.u32 2147483647, %v763_v60  ;;  %3183 = vst [vmem:[#allocation54_spill] sm:$0xff] %v2277_v57  ;;  %v769_v22 = vsub.f32 %v739_v63, %v2070_v35 }
  0xfc   : > { %1510 = vpow2.f32 %v476_v62  ;;  %v482_v20 = vmul.f32 1.442695, %v447_v48  ;;  %v2287_v55 = vand.u32 2147483647, %v750_v14  ;;  %v2289_v60 = vand.u32 2147483647, %v751_v51 }
  0xfd   : > { %3181 = vst [vmem:[#allocation52_spill] sm:$0xff] %v2273_v0  ;;  %1512 = vpow2.f32 %v478_v59  ;;  %v776_v59 = vsub.f32 %v2228_v36, %v2090_v46  ;;  %v770_v48 = vsub.f32 %v739_v63, %v2072_v30  ;;  %v2296_v28 = vand.u32 2147483647, %v752_v21 }
  0xfe   : > { %3182 = vst [vmem:[#allocation53_spill] sm:$0xff] %v2275_v56  ;;  %1514 = vpow2.f32 %v480_v10  ;;  %v771_v10 = vsub.f32 %v739_v63, %v2078_v61  ;;  %v772_v14 = vsub.f32 %v739_v63, %v2090_v46  ;;  %v2310_v57 = vand.u32 2147483647, %v775_v26 }
  0xff   : > { %v422_v33 = vpop.permute.xlu2 %421  ;;  %1516 = vpow2.f32 %v482_v20  ;;  %v2315_v63 = vand.u32 2147483647, %v776_v59  ;;  %v2317_v0 = vand.u32 2147483647, %v769_v22  ;;  %v2319_v53 = vand.u32 2147483647, %v770_v48 }
 0x100   : > { %v456_v62 = vsub.f32 %v1840_v23, %v422_v33  ;;  %v457_v25 = vsub.f32 %v1843_v24, %v422_v33  ;;  %v458_v23 = vsub.f32 %v1848_v27, %v422_v33  ;;  %3186 = vst [vmem:[#allocation57_spill] sm:$0xff] %v2310_v57  ;;  %v757_v24 = vsub.f32 %v2239_v58, %v2070_v35 }
 0x101   : > { %v459_v21 = vsub.f32 %v1870_v37, %v422_v33  ;;  %3187 = vst [vmem:[#allocation58_spill] sm:$0xff] %v2315_v63  ;;  %v2327_v57 = vand.u32 2147483647, %v771_v10  ;;  %v2329_v49 = vand.u32 2147483647, %v772_v14  ;;  %v758_v37 = vsub.f32 %v2239_v58, %v2072_v30 }
 0x102   : > { %v2301_v51 = vpop.eup %1510  ;;  %v500_v56 = vmul.f32 1.442695, %v456_v62  ;;  %v502_v20 = vmul.f32 1.442695, %v457_v25  ;;  %v2325_v26 = vpop.permute.xlu1 %746  ;;  %v759_v22 = vsub.f32 %v2239_v58, %v2078_v61  ;;  %v504_v33 = vmul.f32 1.442695, %v458_v23 }
 0x103   : > { %v2308_v36 = vpop.eup %1512  ;;  %3189 = vst [vmem:[#allocation60_spill] sm:$0xff] %v2329_v49  ;;  %v760_v62 = vsub.f32 %v2239_v58, %v2090_v46  ;;  %v2338_v48 = vand.u32 2147483647, %v757_v24  ;;  %v506_v25 = vmul.f32 1.442695, %v459_v21  ;;  %v766_v58 = vsub.f32 %v2264_v13, %v2072_v30 }
 0x104   : > { %v1013_v4 = vadd.f32 %v2308_v36, %v2301_v51  ;;  %v2323_v27 = vpop.eup %1514  ;;  %1518 = vpow2.f32 %v500_v56 }
 0x105   : > { %3188 = vst [vmem:[#allocation59_spill] sm:$0xff] %v2323_v27  ;;  %v2340_v63 = vpop.eup %1516  ;;  %1520 = vpow2.f32 %v502_v20  ;;  %v768_v20 = vsub.f32 %v2264_v13, %v2090_v46 }
 0x106   : > { %v1014_v59 = vadd.f32 %v2323_v27, %v1013_v4  ;;  %3190 = vst [vmem:[#allocation61_spill] sm:$0xff] %v2340_v63  ;;  %v765_v4 = vsub.f32 %v2264_v13, %v2070_v35  ;;  %1522 = vpow2.f32 %v504_v33 }
 0x107   : > { %v427_v10 = vpop.permute.xlu2 %426  ;;  %1524 = vpow2.f32 %v506_v25 }
 0x108   : > { %v460_v14 = vsub.f32 %v1784_v1, %v427_v10  ;;  %v461_v16 = vsub.f32 %v1787_v2, %v427_v10  ;;  %v462_v49 = vsub.f32 %v1790_v3, %v427_v10  ;;  %v463_v23 = vsub.f32 %v1801_v7, %v427_v10 }
 0x109   : > { %v1015_v56 = vadd.f32 %v2340_v63, %v1014_v59  ;;  %v2351_v1 = vand.u32 2147483647, %v758_v37  ;;  %v2353_v2 = vand.u32 2147483647, %v759_v22  ;;  %v2355_v7 = vand.u32 2147483647, %v760_v62 }
 0x10a   : > { %v508_v24 = vmul.f32 1.442695, %v460_v14  ;;  %v510_v21 = vmul.f32 1.442695, %v461_v16  ;;  %v512_v27 = vmul.f32 1.442695, %v462_v49  ;;  %v767_v10 = vsub.f32 %v2264_v13, %v2078_v61  ;;  %v2361_v33 = vpop.eup %1518 }
 0x10b   : > { %v514_v3 = vmul.f32 1.442695, %v463_v23  ;;  %1016 = vadd.xlane.f32.xlu0 %v1015_v56  ;;  %v2363_v16 = vand.u32 2147483647, %v765_v4  ;;  %v2365_v49 = vand.u32 2147483647, %v766_v58  ;;  %v777_v37 = vsub.f32 %v2325_v26, %v2070_v35  ;;  %v2372_v13 = vpop.eup %1520 }
 0x10c   : > { %1526 = vpow2.f32 %v508_v24  ;;  %v778_v14 = vsub.f32 %v2325_v26, %v2072_v30  ;;  %v779_v23 = vsub.f32 %v2325_v26, %v2078_v61  ;;  %v2379_v56 = vpop.eup %1522 }
 0x10d   : > { %3191 = vst [vmem:[#allocation62_spill] sm:$0xff] %v2363_v16  ;;  %1528 = vpow2.f32 %v510_v21  ;;  %v417_v22 = vpop.permute.xlu1 %416 }
 0x10e   : > { %3192 = vst [vmem:[#allocation63_spill] sm:$0xff] %v2365_v49  ;;  %1530 = vpow2.f32 %v512_v27  ;;  %v452_v59 = vsub.f32 %v1795_v5, %v417_v22  ;;  %v453_v62 = vsub.f32 %v1798_v6, %v417_v22  ;;  %v454_v25 = vsub.f32 %v1804_v8, %v417_v22  ;;  %v2382_v8 = vpop.eup %1524 }
 0x10f   : > { %1532 = vpow2.f32 %v514_v3  ;;  %v455_v4 = vsub.f32 %v1813_v12, %v417_v22  ;;  %v437_v58 = vpop.permute.xlu2 %436  ;;  %v2389_v12 = vand.u32 2147483647, %v767_v10  ;;  %v2391_v22 = vand.u32 2147483647, %v768_v20 }
 0x110   : > { %v492_v27 = vmul.f32 1.442695, %v452_v59  ;;  %v494_v5 = vmul.f32 1.442695, %v453_v62  ;;  %v496_v24 = vmul.f32 1.442695, %v454_v25  ;;  %v468_v6 = vsub.f32 %v1884_v43, %v437_v58 }
 0x111   : > { %v498_v21 = vmul.f32 1.442695, %v455_v4  ;;  %v469_v63 = vsub.f32 %v1887_v44, %v437_v58  ;;  %v470_v49 = vsub.f32 %v1899_v50, %v437_v58  ;;  %v471_v16 = vsub.f32 %v1907_v54, %v437_v58 }
 0x112   : > { %v2387_v3 = vpop.eup %1526  ;;  %1534 = vpow2.f32 %v492_v27  ;;  %v524_v59 = vmul.f32 1.442695, %v468_v6  ;;  %v780_v43 = vsub.f32 %v2325_v26, %v2090_v46  ;;  %v1028_v44 = vadd.f32 %v2372_v13, %v2361_v33 }
 0x113   : > { %v2393_v62 = vpop.eup %1528  ;;  %1536 = vpow2.f32 %v494_v5  ;;  %v526_v25 = vmul.f32 1.442695, %v469_v63  ;;  %v2401_v54 = vand.u32 2147483647, %v777_v37  ;;  %v528_v10 = vmul.f32 1.442695, %v470_v49 }
 0x114   : > { %3193 = vst [vmem:[#allocation64_spill] sm:$0xff] %v2393_v62  ;;  %v2399_v50 = vpop.eup %1530  ;;  %1538 = vpow2.f32 %v496_v24  ;;  %v1033_v20 = vadd.f32 %v2393_v62, %v2387_v3  ;;  %v2407_v58 = vand.u32 2147483647, %v778_v14  ;;  %v2409_v27 = vand.u32 2147483647, %v779_v23 }
 0x115   : > { %3194 = vst [vmem:[#allocation65_spill] sm:$0xff] %v2399_v50  ;;  %v2405_v4 = vpop.eup %1532  ;;  %1540 = vpow2.f32 %v498_v21  ;;  %v530_v63 = vmul.f32 1.442695, %v471_v16  ;;  %v432_v26 = vpop.permute.xlu1 %431  ;;  %v1029_v14 = vadd.f32 %v2379_v56, %v1028_v44 }
 0x116   : > { %3195 = vst [vmem:[#allocation66_spill] sm:$0xff] %v2405_v4  ;;  %1542 = vpow2.f32 %v524_v59  ;;  %v464_v5 = vsub.f32 %v1825_v17, %v432_v26  ;;  %v465_v37 = vsub.f32 %v1828_v18, %v432_v26  ;;  %v466_v24 = vsub.f32 %v1831_v19, %v432_v26 }
 0x117   : > { %3196 = vst [vmem:[#allocation67_spill] sm:$0xff] %v2409_v27  ;;  %1544 = vpow2.f32 %v526_v25  ;;  %v467_v49 = vsub.f32 %v1864_v34, %v432_v26  ;;  %v412_v6 = vpop.permute.xlu0 %411  ;;  %v1034_v62 = vadd.f32 %v2399_v50, %v1033_v20 }
 0x118   : > { %v2417_v23 = vpop.eup %1534  ;;  %1546 = vpow2.f32 %v528_v10  ;;  %v516_v16 = vmul.f32 1.442695, %v464_v5  ;;  %v518_v21 = vmul.f32 1.442695, %v465_v37  ;;  %v520_v59 = vmul.f32 1.442695, %v466_v24  ;;  %v819_v27 = vpop.permute.xlu2 %818 }
 0x119   : > { %v2419_v17 = vpop.eup %1536  ;;  %1548 = vpow2.f32 %v530_v63  ;;  %v522_v18 = vmul.f32 1.442695, %v467_v49  ;;  %v448_v19 = vsub.f32 %v1853_v29, %v412_v6  ;;  %v449_v34 = vsub.f32 %v1857_v31, %v412_v6 }
 0x11a   : > { %v2423_v25 = vpop.eup %1538  ;;  %1550 = vpow2.f32 %v516_v16  ;;  %v450_v44 = vsub.f32 %v1860_v32, %v412_v6  ;;  %v451_v20 = vsub.f32 %v1881_v42, %v412_v6  ;;  %v849_v10 = vmul.f32 %v819_v27, %v2249_v15 }
 0x11b   : > { %v2428_v26 = vpop.eup %1540  ;;  %1552 = vpow2.f32 %v518_v21  ;;  %v484_v5 = vmul.f32 1.442695, %v448_v19  ;;  %v486_v37 = vmul.f32 1.442695, %v449_v34  ;;  %v850_v63 = vmul.f32 %v819_v27, %v2255_v40 }
 0x11c   : > { %v2431_v24 = vpop.eup %1542  ;;  %v2433_v29 = vand.u32 2147483647, %v780_v43  ;;  %1554 = vpow2.f32 %v520_v59  ;;  %v488_v31 = vmul.f32 1.442695, %v450_v44  ;;  %v2436_v49 = vadd.f32 %v2382_v8, %v1029_v14 }
 0x11d   : > { %v2438_v32 = vpop.eup %1544  ;;  %1556 = vpow2.f32 %v522_v18  ;;  %v490_v42 = vmul.f32 1.442695, %v451_v20  ;;  %v851_v15 = vmul.f32 %v819_v27, %v2262_v41  ;;  %v852_v6 = vmul.f32 %v819_v27, %v2268_v9  ;;  %v442_v16 = vpop.permute.xlu1 %441 }
 0x11e   : > { %v2442_v21 = vpop.eup %1546  ;;  %1558 = vpow2.f32 %v484_v5  ;;  %v1403_v40 = vadd.f32 -1.0, %v849_v10  ;;  %v1035_v43 = vadd.f32 %v2405_v4, %v1034_v62  ;;  %v472_v59 = vsub.f32 %v1873_v38, %v442_v16  ;;  %v3205_v4 = vld [vmem:[#allocation31_spill] sm:$0xff] }
 0x11f   : > { %3197 = vst [vmem:[#allocation68_spill] sm:$0xff] %v2442_v21  ;;  %v2446_v19 = vpop.eup %1548  ;;  %1560 = vpow2.f32 %v486_v37  ;;  %v1404_v14 = vadd.f32 -1.0, %v850_v63  ;;  %v473_v18 = vsub.f32 %v1876_v39, %v442_v16  ;;  %v474_v34 = vsub.f32 %v1893_v47, %v442_v16 }
 0x120   : > { %3198 = vst [vmem:[#allocation69_spill] sm:$0xff] %v2446_v19  ;;  %v2450_v41 = vpop.eup %1550  ;;  %1562 = vpow2.f32 %v488_v31  ;;  %1036 = vadd.xlane.f32.xlu0 %v1035_v43  ;;  %v475_v9 = vsub.f32 %v1903_v52, %v442_v16  ;;  %v532_v27 = vmul.f32 1.442695, %v472_v59  ;;  %v815_v44 = vpop.permute.xlu0 %814  ;;  %v1023_v38 = vadd.f32 %v2419_v17, %v2417_v23 }
 0x121   : > { %v827_v20 = vpop.permute.xlu2 %826  ;;  %v2455_v62 = vpop.eup %1552  ;;  %1564 = vpow2.f32 %v490_v42  ;;  %v534_v10 = vmul.f32 1.442695, %v473_v18  ;;  %v536_v5 = vmul.f32 1.442695, %v474_v34  ;;  %v845_v39 = vmul.f32 %v815_v44, %v2283_v11  ;;  %v3200_v34 = vld [vmem:[#allocation52_spill] sm:$0xff] }
 0x122   : > { %v2458_v47 = vpop.eup %1554  ;;  %1566 = vpow2.f32 %v532_v27  ;;  %v538_v37 = vmul.f32 1.442695, %v475_v9  ;;  %v846_v63 = vmul.f32 %v815_v44, %v2287_v55  ;;  %v847_v52 = vmul.f32 %v815_v44, %v2289_v60 }
 0x123   : > { %v2462_v31 = vpop.eup %1556  ;;  %1568 = vpow2.f32 %v534_v10  ;;  %v848_v16 = vmul.f32 %v815_v44, %v2296_v28  ;;  %v1399_v43 = vadd.f32 -1.0, %v845_v39  ;;  %v857_v42 = vmul.f32 %v827_v20, %v2270_v45  ;;  %v3203_v10 = vld [vmem:[#allocation53_spill] sm:$0xff]  ;;  %v3204_v39 = vld [vmem:[#allocation54_spill] sm:$0xff] }
 0x124   : > { %v2466_v59 = vpop.eup %1558  ;;  %v2468_v18 = vadd.f32 -1.0, %v851_v15  ;;  %1570 = vpow2.f32 %v536_v5  ;;  %v1400_v11 = vadd.f32 -1.0, %v846_v63  ;;  %v858_v9 = vmul.f32 %v827_v20, %v3200_v34 }
 0x125   : > { %v2471_v27 = vpop.eup %1560  ;;  %v2473_v55 = vadd.f32 -1.0, %v852_v6  ;;  %v2476_v60 = vmul.f32 %v2466_v59, %v1403_v40  ;;  %1572 = vpow2.f32 %v538_v37  ;;  %v2478_v28 = vadd.f32 -1.0, %v847_v52  ;;  %v3206_v40 = vld [vmem:[#allocation42_spill] sm:$0xff] }
 0x126   : > { %3199 = vst [vmem:[#allocation70_spill] sm:$0xff] %v2468_v18  ;;  %v2480_v44 = vpop.eup %1562  ;;  %v2482_v45 = vadd.f32 -1.0, %v848_v16  ;;  %v2485_v15 = vmul.f32 %v2301_v51, %v1399_v43  ;;  %v859_v5 = vmul.f32 %v827_v20, %v3203_v10  ;;  %v860_v63 = vmul.f32 %v827_v20, %v3204_v39  ;;  %v823_v34 = vpop.permute.xlu1 %822 }
 0x127   : > { %3201 = vst [vmem:[#allocation52_spill] sm:$0xff] %v2473_v55  ;;  %v2489_v6 = vpop.eup %1564  ;;  %vm589_vm3 = vcmp.ge.f32.partialorder %v2070_v35, %v3205_v4  ;;  %vm653_vm0 = vcmp.le.f32.partialorder %v2070_v35, %v3206_v40  ;;  %v1411_v37 = vadd.f32 -1.0, %v857_v42  ;;  %v1412_v52 = vadd.f32 -1.0, %v858_v9 }
 0x128   : > { %3202 = vst [vmem:[#allocation71_spill] sm:$0xff] %v2476_v60  ;;  %v1024_v16 = vadd.f32 %v2423_v25, %v1023_v38  ;;  %v853_v51 = vmul.f32 %v823_v34, %v2338_v48  ;;  %v2497_v43 = vpop.eup %1566  ;;  %vm590_vm1 = vcmp.ge.f32.partialorder %v2072_v30, %v3205_v4  ;;  %vm654_vm2 = vcmp.le.f32.partialorder %v2072_v30, %v3206_v40  ;;  %v835_v9 = vpop.permute.xlu0 %834  ;;  %vm2583_vm10 = vmand %vm589_vm3, %vm653_vm0 }
 0x129   : > { %v2504_v20 = vmul.f32 %v2471_v27, %v1404_v14  ;;  %v2507_v10 = vmul.f32 %v2308_v36, %v1400_v11  ;;  %v854_v42 = vmul.f32 %v823_v34, %v2351_v1  ;;  %v855_v38 = vmul.f32 %v823_v34, %v2353_v2  ;;  %v2511_v48 = vpop.eup %1568  ;;  %v839_v1 = vpop.permute.xlu2 %838  ;;  %vm2599_vm3 = vmand %vm590_vm1, %vm654_vm2 }
 0x12a   : > { %v2517_v39 = vadd.f32 -1.0, %v859_v5  ;;  %v2519_v14 = vadd.f32 -1.0, %v860_v63  ;;  %v1025_v36 = vadd.f32 %v2428_v26, %v1024_v16  ;;  %v856_v11 = vmul.f32 %v823_v34, %v2355_v7  ;;  %v2523_v50 = vpop.eup %1570  ;;  %v3208_v34 = vld [vmem:[#allocation60_spill] sm:$0xff] }
 0x12b   : > { %3207 = vst [vmem:[#allocation53_spill] sm:$0xff] %v2504_v20  ;;  %v2526_v2 = vmul.f32 %v2361_v33, %v1411_v37  ;;  %v1407_v20 = vadd.f32 -1.0, %v853_v51  ;;  %v1408_v60 = vadd.f32 -1.0, %v854_v42  ;;  %v865_v55 = vmul.f32 %v835_v9, %v2317_v0  ;;  %v2529_v18 = vpop.eup %1572  ;;  %v3209_v37 = vld [vmem:[#allocation55_spill] sm:$0xff] }
 0x12c   : > { %v2532_v5 = vmul.f32 %v2372_v13, %v1412_v52  ;;  %1026 = vadd.xlane.f32.xlu1 %v1025_v36  ;;  %v866_v63 = vmul.f32 %v835_v9, %v2319_v53  ;;  %v867_v7 = vmul.f32 %v835_v9, %v2327_v57  ;;  %v868_v16 = vmul.f32 %v835_v9, %v3208_v34  ;;  %v3210_v52 = vld [vmem:[#allocation56_spill] sm:$0xff] }
 0x12d   : > { %v1409_v19 = vadd.f32 -1.0, %v855_v38  ;;  %v1410_v21 = vadd.f32 -1.0, %v856_v11  ;;  %v1419_v33 = vadd.f32 -1.0, %v865_v55  ;;  %v869_v51 = vmul.f32 %v839_v1, %v3209_v37  ;;  %v3211_v55 = vld [vmem:[#allocation57_spill] sm:$0xff]  ;;  %v3213_v37 = vld [vmem:[#allocation62_spill] sm:$0xff] }
 0x12e   : > { %v2539_v42 = vmul.f32 %v2417_v23, %v1407_v20  ;;  %v2542_v0 = vmul.f32 %v2419_v17, %v1408_v60  ;;  %v1420_v13 = vadd.f32 -1.0, %v866_v63  ;;  %v870_v36 = vmul.f32 %v839_v1, %v3210_v52  ;;  %v3212_v23 = vld [vmem:[#allocation58_spill] sm:$0xff]  ;;  %v831_v9 = vpop.permute.xlu1 %830 }
 0x12f   : > { %v2549_v57 = vadd.f32 -1.0, %v867_v7  ;;  %v2551_v53 = vadd.f32 -1.0, %v868_v16  ;;  %v871_v38 = vmul.f32 %v839_v1, %v3211_v55  ;;  %v872_v20 = vmul.f32 %v839_v1, %v3212_v23  ;;  %v3214_v1 = vld [vmem:[#allocation36_spill] sm:$0xff]  ;;  %v3219_v23 = vld [vmem:[#allocation59_spill] sm:$0xff] }
 0x130   : > { %v1423_v17 = vadd.f32 -1.0, %v869_v51  ;;  %v1424_v60 = vadd.f32 -1.0, %v870_v36  ;;  %v1038_v11 = vadd.f32 %v2455_v62, %v2450_v41  ;;  %v1018_v63 = vadd.f32 %v2471_v27, %v2466_v59  ;;  %v3215_v51 = vld [vmem:[#allocation47_spill] sm:$0xff] }
 0x131   : > { %v2560_v34 = vmul.f32 %v2450_v41, %v1419_v33  ;;  %v2563_v7 = vmul.f32 %v2455_v62, %v1420_v13  ;;  %v2565_v16 = vadd.f32 -1.0, %v871_v38  ;;  %v861_v52 = vmul.f32 %v831_v9, %v3213_v37  ;;  %v3216_v27 = vld [vmem:[#allocation63_spill] sm:$0xff] }
 0x132   : > { %vm673_vm15 = vcmp.le.f32.partialorder %v2070_v35, %v3215_v51  ;;  %v2572_v36 = vadd.f32 -1.0, %v872_v20  ;;  %v1039_v59 = vadd.f32 %v2458_v47, %v1038_v11  ;;  %v1019_v41 = vadd.f32 %v2480_v44, %v1018_v63 }
 0x133   : > { %v862_v33 = vmul.f32 %v831_v9, %v3216_v27  ;;  %v863_v13 = vmul.f32 %v831_v9, %v2389_v12  ;;  %v864_v55 = vmul.f32 %v831_v9, %v2391_v22  ;;  %v1415_v38 = vadd.f32 -1.0, %v861_v52 }
 0x134   : > { %v911_v20 = vmul.f32 %v3219_v23, %v2478_v28  ;;  %vm674_vm0 = vcmp.le.f32.partialorder %v2072_v30, %v3215_v51  ;;  %v2606_v12 = vmul.f32 %v2431_v24, %v1423_v17  ;;  %v2609_v22 = vmul.f32 %v2438_v32, %v1424_v60  ;;  %v3226_v17 = vld [vmem:[#allocation61_spill] sm:$0xff]  ;;  %v3227_v23 = vld [vmem:[#allocation67_spill] sm:$0xff] }
 0x135   : > { %v1040_v28 = vadd.f32 %v2462_v31, %v1039_v59  ;;  %v1020_v9 = vadd.f32 %v2489_v6, %v1019_v41  ;;  %v1416_v63 = vadd.f32 -1.0, %v862_v33  ;;  %v2613_v37 = vadd.f32 -1.0, %v863_v13 }
 0x136   : > { %vm3222_vm1 = vcmp.le.f32.partialorder %v2078_v61, %v3206_v40  ;;  %vm3223_vm2 = vcmp.ge.f32.partialorder %v2078_v61, %v3205_v4  ;;  %v912_v60 = vmul.f32 %v3226_v17, %v2482_v45  ;;  %v941_v59 = vsel %vm2583_vm10, %v2485_v15, 0.0  ;;  %v843_v62 = vpop.permute.xlu1 %842 }
 0x137   : > { %vm2621_vm8 = vmand %vm3223_vm2, %vm3222_vm1  ;;  %1041 = vadd.xlane.f32.xlu1 %v1040_v28  ;;  %1021 = vadd.xlane.f32.xlu2 %v1020_v9  ;;  %v2630_v41 = vadd.f32 -1.0, %v864_v55  ;;  %v2633_v27 = vmul.f32 %v2387_v3, %v1415_v38  ;;  %v942_v33 = vsel %vm2599_vm3, %v2507_v10, 0.0  ;;  %vm611_vm1 = vcmp.ge.f32.partialorder %v2078_v61, %v3214_v1 }
 0x138   : > { %v943_v13 = vsel %vm2621_vm8, %v911_v20, 0.0  ;;  %vm675_vm10 = vcmp.le.f32.partialorder %v2078_v61, %v3215_v51  ;;  %v973_v45 = vadd.f32 %v942_v33, %v941_v59  ;;  %v1048_v15 = vadd.f32 %v2511_v48, %v2497_v43 }
 0x139   : > { %v919_v3 = vmul.f32 %v2423_v25, %v1409_v19  ;;  %v920_v55 = vmul.f32 %v2428_v26, %v1410_v21  ;;  %v873_v10 = vmul.f32 %v843_v62, %v2401_v54  ;;  %v874_v38 = vmul.f32 %v843_v62, %v2407_v58  ;;  %v3232_v19 = vld [vmem:[#allocation64_spill] sm:$0xff]  ;;  %v3248_v26 = vld [vmem:[#allocation69_spill] sm:$0xff]  ;;  %v3249_v58 = vld [vmem:[#allocation70_spill] sm:$0xff] }
 0x13a   : > { %v875_v20 = vmul.f32 %v843_v62, %v3227_v23  ;;  %v876_v11 = vmul.f32 %v843_v62, %v2433_v29  ;;  %vm3228_vm8 = vcmp.le.f32.partialorder %v2090_v46, %v3206_v40  ;;  %vm3229_vm3 = vcmp.ge.f32.partialorder %v2090_v46, %v3205_v4 }
 0x13b   : > { %vm688_vm2 = vmand %vm3229_vm3, %vm3228_vm8  ;;  %v974_v28 = vadd.f32 %v973_v45, %v943_v13  ;;  %v1049_v25 = vadd.f32 %v2523_v50, %v1048_v15  ;;  %v949_v54 = vsel %vm2166_vm6, %v2539_v42, 0.0  ;;  %v950_v21 = vsel %vm2172_vm13, %v2542_v0, 0.0  ;;  %v3259_v13 = vld [vmem:[#allocation27_spill] sm:$0xff]  ;;  %v3261_v42 = vld [vmem:[#allocation33_spill] sm:$0xff] }
 0x13c   : > { %v2666_v29 = vmul.f32 %v3232_v19, %v1416_v63  ;;  %v944_v9 = vsel %vm688_vm2, %v912_v60, 0.0  ;;  %v1427_v40 = vadd.f32 -1.0, %v873_v10  ;;  %v1428_v52 = vadd.f32 -1.0, %v874_v38  ;;  %v3242_v38 = vld [vmem:[#allocation68_spill] sm:$0xff] }
 0x13d   : > { %v975_v17 = vadd.f32 %v974_v28, %v944_v9  ;;  %v1050_v4 = vadd.f32 %v2529_v18, %v1049_v25  ;;  %v1429_v59 = vadd.f32 -1.0, %v875_v20  ;;  %v2669_v33 = vadd.f32 -1.0, %v876_v11 }
 0x13e   : > { %v951_v45 = vsel %vm2177_vm7, %v919_v3, 0.0  ;;  %v952_v15 = vsel %vm2181_vm5, %v920_v55, 0.0  ;;  %v983_v62 = vadd.f32 %v950_v21, %v949_v54  ;;  %v1043_v0 = vadd.f32 %v2438_v32, %v2431_v24  ;;  %v3238_v55 = vld [vmem:[#allocation28_spill] sm:$0xff]  ;;  %v3240_v32 = vld [vmem:[#allocation29_spill] sm:$0xff] }
 0x13f   : > { %vm3235_vm6 = vcmp.ge.f32.partialorder %v2070_v35, %v3214_v1  ;;  %1051 = vadd.xlane.f32.xlu0 %v1050_v4  ;;  %v923_v60 = vmul.f32 %v2379_v56, %v2517_v39  ;;  %v924_v3 = vmul.f32 %v2382_v8, %v2519_v14  ;;  %vm3239_vm5 = vnez %v3238_v55  ;;  %v3246_v14 = vld [vmem:[#allocation32_spill] sm:$0xff] }
 0x140   : > { %vm2683_vm13 = vmand %vm3235_vm6, %vm673_vm15  ;;  %v953_v24 = vsel %vm3239_vm5, %v2526_v2, 0.0  ;;  %vm3241_vm7 = vnez %v3240_v32  ;;  %976 = vadd.xlane.f32.xlu1 %v975_v17  ;;  %1031 = vadd.xlane.f32.xlu2 %v2436_v49  ;;  %v984_v35 = vadd.f32 %v983_v62, %v951_v45  ;;  %v1044_v23 = vadd.f32 %v3242_v38, %v1043_v0  ;;  %v3244_v49 = vld [vmem:[#allocation30_spill] sm:$0xff]  ;;  %v3269_v32 = vld [vmem:[#allocation65_spill] sm:$0xff] }
 0x141   : > { %v954_v10 = vsel %vm3241_vm7, %v2532_v5, 0.0  ;;  %vm612_vm15 = vcmp.ge.f32.partialorder %v2090_v46, %v3214_v1  ;;  %vm676_vm8 = vcmp.le.f32.partialorder %v2090_v46, %v3215_v51  ;;  %v961_v56 = vsel %vm2683_vm13, %v2560_v34, 0.0  ;;  %v3263_v62 = vld [vmem:[#allocation34_spill] sm:$0xff] }
 0x142   : > { %v988_v20 = vadd.f32 %v954_v10, %v953_v24  ;;  %vm3243_vm3 = vcmp.ge.f32.partialorder %v2072_v30, %v3214_v1  ;;  %v937_v8 = vmul.f32 %v2497_v43, %v1427_v40  ;;  %vm3245_vm6 = vnez %v3244_v49  ;;  %v3267_v24 = vld [vmem:[#allocation37_spill] sm:$0xff] }
 0x143   : > { %vm706_vm2 = vmand %vm3243_vm3, %vm674_vm0  ;;  %v955_v39 = vsel %vm3245_vm6, %v923_v60, 0.0  ;;  %vm3247_vm5 = vnez %v3246_v14  ;;  %v931_v5 = vmul.f32 %v2458_v47, %v2549_v57  ;;  %v938_v34 = vmul.f32 %v2511_v48, %v1428_v52  ;;  %v3250_v47 = vld [vmem:[#allocation52_spill] sm:$0xff]  ;;  %v3251_v57 = vld [vmem:[#allocation71_spill] sm:$0xff] }
 0x144   : > { %v956_v2 = vsel %vm3247_vm5, %v924_v3, 0.0  ;;  %v985_v11 = vadd.f32 %v984_v35, %v952_v15  ;;  %v989_v28 = vadd.f32 %v988_v20, %v955_v39  ;;  %v962_v25 = vsel %vm706_vm2, %v2563_v7, 0.0  ;;  %vm707_vm0 = vmand %vm611_vm1, %vm675_vm10  ;;  %v3252_v7 = vld [vmem:[#allocation24_spill] sm:$0xff]  ;;  %v3257_v52 = vld [vmem:[#allocation26_spill] sm:$0xff] }
 0x145   : > { %v1045_v30 = vadd.f32 %v3248_v26, %v1044_v23  ;;  %v932_v43 = vmul.f32 %v2462_v31, %v2551_v53  ;;  %v998_v54 = vadd.f32 %v962_v25, %v961_v56  ;;  %v915_v21 = vmul.f32 %v2480_v44, %v3249_v58  ;;  %v3254_v31 = vld [vmem:[#allocation53_spill] sm:$0xff]  ;;  %v3265_v3 = vld [vmem:[#allocation35_spill] sm:$0xff]  ;;  %v3272_v56 = vld [vmem:[#allocation44_spill] sm:$0xff] }
 0x146   : > { %v990_v19 = vadd.f32 %v989_v28, %v956_v2  ;;  %v916_v48 = vmul.f32 %v2489_v6, %v3250_v47  ;;  %vm3253_vm13 = vnez %v3252_v7  ;;  %v3255_v53 = vld [vmem:[#allocation25_spill] sm:$0xff]  ;;  %v963_v44 = vsel %vm707_vm0, %v931_v5, 0.0 }
 0x147   : > { %v945_v9 = vsel %vm3253_vm13, %v3251_v57, 0.0  ;;  %vm3256_vm7 = vnez %v3255_v53  ;;  %vm3258_vm3 = vnez %v3257_v52  ;;  %v935_v61 = vmul.f32 %v3242_v38, %v2565_v16  ;;  %986 = vadd.xlane.f32.xlu0 %v985_v11  ;;  %v3274_v14 = vld [vmem:[#allocation45_spill] sm:$0xff]  ;;  %v3287_v53 = vld [vmem:[#allocation10_spill] sm:$0xff] }
 0x148   : > { %v946_v40 = vsel %vm3256_vm7, %v3254_v31, 0.0  ;;  %v947_v17 = vsel %vm3258_vm3, %v915_v21, 0.0  ;;  %vm3260_vm1 = vnez %v3259_v13  ;;  %v936_v6 = vmul.f32 %v3248_v26, %v2572_v36  ;;  %1046 = vadd.xlane.f32.xlu2 %v1045_v30  ;;  %991 = vadd.xlane.f32.xlu1 %v990_v19  ;;  %vm708_vm7 = vmand %vm612_vm15, %vm676_vm8  ;;  %v3278_v30 = vld [vmem:[#allocation46_spill] sm:$0xff]  ;;  %v3286_v31 = vld [vmem:[#allocation8_spill] sm:$0xff] }
 0x149   : > { %v978_v4 = vadd.f32 %v946_v40, %v945_v9  ;;  %v948_v45 = vsel %vm3260_vm1, %v916_v48, 0.0  ;;  %vm3262_vm10 = vnez %v3261_v42  ;;  %vm3264_vm2 = vnez %v3263_v62  ;;  %v1053_v48 = vld [vmem:[#allocation3] sm:$0xff]  ;;  %v3293_v62 = vld [vmem:[#allocation14_spill] sm:$0xff] }
 0x14a   : > { %v965_v15 = vsel %vm3262_vm10, %v2606_v12, 0.0  ;;  %v966_v0 = vsel %vm3264_vm2, %v2609_v22, 0.0  ;;  %v999_v63 = vadd.f32 %v998_v54, %v963_v44  ;;  %vm3266_vm6 = vnez %v3265_v3  ;;  %v3270_v12 = vld [vmem:[#allocation66_spill] sm:$0xff] }
 0x14b   : > { %v979_v60 = vadd.f32 %v978_v4, %v947_v17  ;;  %v967_v16 = vsel %vm3266_vm6, %v935_v61, 0.0  ;;  %v1003_v55 = vadd.f32 %v966_v0, %v965_v15  ;;  %vm3268_vm5 = vnez %v3267_v24  ;;  %v1057_v17 = vld [vmem:[#allocation3 + $0x20] sm:$0xff]  ;;  %v3289_v4 = vld [vmem:[#allocation9_spill] sm:$0xff]  ;;  %v3297_v24 = vld [vmem:[#allocation19_spill] sm:$0xff] }
 0x14c   : > { %v968_v36 = vsel %vm3268_vm5, %v936_v6, 0.0  ;;  %v927_v10 = vmul.f32 %v3269_v32, %v2613_v37  ;;  %v928_v35 = vmul.f32 %v3270_v12, %v2630_v41  ;;  %v957_v38 = vsel %vm2192_vm11, %v2633_v27, 0.0  ;;  %v3290_v61 = vld [vmem:[#allocation12_spill] sm:$0xff]  ;;  %v1058_v27 = vld [vmem:[#allocation3 + $0x28] sm:$0xff] }
 0x14d   : > { %v980_v23 = vadd.f32 %v979_v60, %v948_v45  ;;  %v1004_v20 = vadd.f32 %v1003_v55, %v967_v16  ;;  %vm3273_vm0 = vnez %v3272_v56  ;;  %v939_v39 = vmul.f32 %v2523_v50, %v1429_v59  ;;  %v3294_v0 = vld [vmem:[#allocation16_spill] sm:$0xff]  ;;  %v1055_v16 = vld [vmem:[#allocation3 + $0x10] sm:$0xff]  ;;  %v3296_v55 = vld [vmem:[#allocation17_spill] sm:$0xff] }
 0x14e   : > { %v958_v49 = vsel %vm3273_vm0, %v2666_v29, 0.0  ;;  %vm3275_vm13 = vnez %v3274_v14  ;;  %v940_v41 = vmul.f32 %v2529_v18, %v2669_v33  ;;  %v969_v29 = vsel %vm2218_vm9, %v937_v8, 0.0 }
 0x14f   : > { %v959_v2 = vsel %vm3275_vm13, %v927_v10, 0.0  ;;  %v993_v5 = vadd.f32 %v958_v49, %v957_v38  ;;  %v1005_v37 = vadd.f32 %v1004_v20, %v968_v36  ;;  %v970_v50 = vsel %vm2223_vm12, %v938_v34, 0.0  ;;  %v3282_v34 = vld [vmem:[#allocation11_spill] sm:$0xff]  ;;  %v3299_v38 = vld [vmem:[#allocation20_spill] sm:$0xff] }
 0x150   : > { %v964_v59 = vsel %vm708_vm7, %v932_v43, 0.0  ;;  %v1008_v25 = vadd.f32 %v970_v50, %v969_v29  ;;  %vm3279_vm11 = vnez %v3278_v30  ;;  %v971_v46 = vsel %vm2231_vm4, %v939_v39, 0.0  ;;  %981 = vadd.xlane.f32.xlu2 %v980_v23  ;;  %v3283_v43 = vld [vmem:[#allocation13_spill] sm:$0xff]  ;;  %v3300_v23 = vld [vmem:[#allocation22_spill] sm:$0xff]  ;;  %v3303_v49 = vld [vmem:[#allocation15_spill] sm:$0xff] }
 0x151   : > { %v994_v28 = vadd.f32 %v993_v5, %v959_v2  ;;  %v1000_v26 = vadd.f32 %v999_v63, %v964_v59  ;;  %v960_v51 = vsel %vm3279_vm11, %v928_v35, 0.0  ;;  %v972_v33 = vsel %vm2235_vm14, %v940_v41, 0.0  ;;  %1006 = vadd.xlane.f32.xlu1 %v1005_v37  ;;  %v3304_v39 = vld [vmem:[#allocation18_spill] sm:$0xff]  ;;  %v1054_v29 = vld [vmem:[#allocation3 + $0x8] sm:$0xff] }
 0x152   : > { %v1009_v58 = vadd.f32 %v1008_v25, %v971_v46  ;;  %v3284_v21 = vsub.f32 %v3282_v34, %v3283_v43  ;;  %vm3285_vm4 = vcmask 7168   ;;  %v3288_v40 = vsub.f32 %v3286_v31, %v3287_v53  ;;  %v3306_v30 = vld [vmem:[#allocation21_spill] sm:$0xff]  ;;  %v1086_v43 = vld [vmem:[#allocation4] sm:$0xff] }
 0x153   : > { %v995_v1 = vadd.f32 %v994_v28, %v960_v51  ;;  %1001 = vadd.xlane.f32.xlu0 %v1000_v26  ;;  %v3291_v13 = vsub.f32 %v3289_v4, %v3290_v61  ;;  %vm3292_vm9 = vmmov %vm3285_vm4  ;;  %v3295_v63 = vsub.f32 %v3293_v62, %v3294_v0  ;;  %v3298_v36 = vsub.f32 %v3296_v55, %v3297_v24  ;;  %v3307_v51 = vld [vmem:[#allocation23_spill] sm:$0xff] }
 0x154   : > { %v1010_v8 = vadd.f32 %v1009_v58, %v972_v33  ;;  %v388_v19 = vmul.f32 1.442695, %v3284_v21  ;;  %v396_v44 = vmul.f32 1.442695, %v3288_v40  ;;  %v3301_v20 = vsub.f32 %v3299_v38, %v3300_v23  ;;  %vm3302_vm12 = vmmov %vm3285_vm4  ;;  %v1056_v21 = vld [vmem:[#allocation3 + $0x18] sm:$0xff] }
 0x155   : > { %v392_v45 = vmul.f32 1.442695, %v3291_v13  ;;  %v398_v60 = vmul.f32 1.442695, %v3295_v63  ;;  %v390_v32 = vmul.f32 1.442695, %v3298_v36  ;;  %v3305_v14 = vsub.f32 %v3303_v49, %v3304_v39  ;;  %vm3309_vm14 = vmmov %vm3285_vm4 }
 0x156   : > { %1574 = vpow2.f32 %v388_v19  ;;  %v402_v56 = vmul.f32 1.442695, %v3301_v20  ;;  %v3308_v54 = vsub.f32 %v3306_v30, %v3307_v51  ;;  %vm3310_vm15 = vmmov %vm3285_vm4  ;;  %v1089_v63 = vld [vmem:[#allocation4 + $0x18] sm:$0xff]  ;;  %v1091_v30 = vld [vmem:[#allocation4 + $0x28] sm:$0xff] }
 0x157   : > { %1576 = vpow2.f32 %v396_v44  ;;  %v394_v2 = vmul.f32 1.442695, %v3305_v14  ;;  %vm3311_vm8 = vmmov %vm3285_vm4 }
 0x158   : > { %996 = vadd.xlane.f32.xlu2 %v995_v1  ;;  %1578 = vpow2.f32 %v392_v45  ;;  %v400_v46 = vmul.f32 1.442695, %v3308_v54  ;;  %vm3312_vm3 = vmmov %vm3285_vm4 }
 0x159   : > { %1580 = vpow2.f32 %v398_v60  ;;  %vm3313_vm10 = vmmov %vm3312_vm3  ;;  %v1059_v60 = vld [vmem:[#allocation3 + $0x30] sm:$0xff] }
 0x15a   : > { %vm3316_vm13 = vmmov %vm3312_vm3 }
 0x15b   : > { %vm3317_vm7 = vmmov %vm3312_vm3 }
 0x15c   : > { %v1575_v47 = vpop.eup %1574 }
 0x15d   : > { %v1061_v57 = vmul.f32 %v1575_v47, %v1053_v48  ;;  %v2796_v52 = vpop.eup %1576 }
 0x15e   : > { %v1065_v6 = vmul.f32 %v2796_v52, %v1057_v17  ;;  %v2806_v3 = vpop.eup %1578 }
 0x15f   : > { %v1063_v12 = vmul.f32 %v2806_v3, %v1055_v16  ;;  %v2822_v5 = vpop.eup %1580 }
 0x160   : > { %1011 = vadd.xlane.f32.xlu2 %v1010_v8  ;;  %v1066_v59 = vmul.f32 %v2822_v5, %v1058_v27  ;;  %v1060_v8 = vld [vmem:[#allocation3 + $0x38] sm:$0xff] }
 0x17e   : > { %v1017_v7 = vpop.xlane.xlu0 %1016 }
 0x17f   : > { %v1069_v9 = vadd.f32 %v1061_v57, %v1017_v7 }
 0x181   : > { %1078 = vst.msk [vmem:[#allocation3] sm:$0xff] %vm3285_vm4, %v1069_v9  ;;  %v1094_v9 = vmul.f32 %v1575_v47, %v1086_v43  ;;  %vm3318_vm4 = vmmov %vm3312_vm3  ;;  %v1090_v43 = vld [vmem:[#allocation4 + $0x20] sm:$0xff] }
 0x188   : > { %v2811_v10 = vld [vmem:[#allocation3] sm:$0xff] }
 0x189   : > { %1582 = vrcp.f32 %v2811_v10  ;;  %v1156_v62 = vand.u32 2147483648, %v2811_v10  ;;  %vm1150_vm2 = vweird.f32 %v2811_v10  ;;  %v1154_v16 = vand.u32 2147483647, %v2811_v10 }
 0x18a   : > { %1584 = vpow2.f32 %v390_v32 }
 0x18b   : > { %1586 = vpow2.f32 %v402_v56  ;;  %v1157_v23 = vor.u32 1.1754944e-38, %v1156_v62  ;;  %vm1155_vm5 = vcmp.eq.f32.partialorder %v1154_v16, 8.507059e+37 }
 0x18c   : > { %1588 = vpow2.f32 %v394_v2 }
 0x18f   : > { %v2824_v37 = vpop.eup %1582 }
 0x190   : > { %v2826_v41 = vpop.eup %1584  ;;  %v1146_v11 = vmul.f32 %v2824_v37, %v2811_v10  ;;  %vm1151_vm1 = vweird.f32 %v2824_v37 }
 0x191   : > { %v1062_v25 = vmul.f32 %v2826_v41, %v1054_v29  ;;  %v2838_v18 = vpop.eup %1586  ;;  %vm2868_vm6 = vmor %vm1150_vm2, %vm1151_vm1 }
 0x192   : > { %v1147_v33 = vsub.f32 1.0, %v1146_v11  ;;  %v1589_v34 = vpop.eup %1588  ;;  %v1068_v48 = vmul.f32 %v2838_v18, %v1060_v8  ;;  %vm3322_vm1 = vmmov %vm3312_vm3 }
 0x193   : > { %v1037_v42 = vpop.xlane.xlu0 %1036  ;;  %v1064_v53 = vmul.f32 %v1589_v34, %v1056_v21  ;;  %vm3323_vm2 = vmmov %vm3322_vm1 }
 0x194   : > { %v1073_v15 = vadd.f32 %v1065_v6, %v1037_v42  ;;  %v1148_v7 = vmul.f32 %v2824_v37, %v1147_v33  ;;  %v1088_v42 = vld [vmem:[#allocation4 + $0x10] sm:$0xff] }
 0x195   : > { %v1096_v32 = vmul.f32 %v2806_v3, %v1088_v42 }
 0x196   : > { %1082 = vst.msk [vmem:[#allocation3 + $0x20] sm:$0xff] %vm3292_vm9, %v1073_v15  ;;  %v1149_v47 = vadd.f32 %v2824_v37, %v1148_v7 }
 0x19d   : > { %v2841_v19 = vld [vmem:[#allocation3 + $0x20] sm:$0xff] }
 0x19f   : > { %v1027_v35 = vpop.xlane.xlu1 %1026 }
 0x1a0   : > { %v1071_v22 = vadd.f32 %v1063_v12, %v1027_v35  ;;  %v1153_v12 = vsel %vm2868_vm6, %v2824_v37, %v1149_v47  ;;  %vm1206_vm6 = vweird.f32 %v2841_v19 }
 0x1a1   : > { %v1158_v27 = vsel %vm1155_vm5, %v1157_v23, %v1153_v12 }
 0x1a2   : > { %1080 = vst.msk [vmem:[#allocation3 + $0x10] sm:$0xff] %vm3302_vm12, %v1071_v22  ;;  %v1097_v22 = vmul.f32 %v1589_v34, %v1089_v63  ;;  %vm3321_vm12 = vmmov %vm3312_vm3 }
 0x1a9   : > { %v2830_v50 = vld [vmem:[#allocation3 + $0x10] sm:$0xff] }
 0x1aa   : > { %v1042_v28 = vpop.xlane.xlu1 %1041  ;;  %v1022_v26 = vpop.xlane.xlu2 %1021  ;;  %1590 = vrcp.f32 %v2830_v50  ;;  %vm1178_vm11 = vweird.f32 %v2830_v50  ;;  %v1182_v54 = vand.u32 2147483647, %v2830_v50 }
 0x1ab   : > { %v1074_v1 = vadd.f32 %v1066_v59, %v1042_v28  ;;  %v1070_v58 = vadd.f32 %v1062_v25, %v1022_v26  ;;  %1592 = vpow2.f32 %v400_v46  ;;  %v1184_v59 = vand.u32 2147483648, %v2830_v50  ;;  %v1092_v46 = vld [vmem:[#allocation4 + $0x30] sm:$0xff] }
 0x1ac   : > { %1594 = vrcp.f32 %v2841_v19 }
 0x1ad   : > { %1083 = vst.msk [vmem:[#allocation3 + $0x28] sm:$0xff] %vm3309_vm14, %v1074_v1  ;;  %v1087_v1 = vld [vmem:[#allocation4 + $0x8] sm:$0xff]  ;;  %vm1183_vm14 = vcmp.eq.f32.partialorder %v1182_v54, 8.507059e+37 }
 0x1ae   : > { %1079 = vst.msk [vmem:[#allocation3 + $0x8] sm:$0xff] %vm3310_vm15, %v1070_v58 }
 0x1b0   : > { %v2845_v57 = vpop.eup %1590 }
 0x1b1   : > { %v1174_v40 = vmul.f32 %v2845_v57, %v2830_v50  ;;  %v1593_v15 = vpop.eup %1592  ;;  %vm1179_vm0 = vweird.f32 %v2845_v57 }
 0x1b2   : > { %v1052_v31 = vpop.xlane.xlu0 %1051  ;;  %v2865_v55 = vpop.eup %1594  ;;  %v1067_v38 = vmul.f32 %v1593_v15, %v1059_v60  ;;  %vm2909_vm9 = vmor %vm1178_vm11, %vm1179_vm0 }
 0x1b3   : > { %v977_v44 = vpop.xlane.xlu1 %976  ;;  %v1076_v17 = vadd.f32 %v1068_v48, %v1052_v31  ;;  %v1032_v4 = vpop.xlane.xlu2 %1031  ;;  %v1175_v45 = vsub.f32 1.0, %v1174_v40  ;;  %v1202_v49 = vmul.f32 %v2865_v55, %v2841_v19  ;;  %v1099_v48 = vmul.f32 %v2822_v5, %v1091_v30 }
 0x1b4   : > { %v1102_v61 = vadd.f32 %v1094_v9, %v977_v44  ;;  %v1072_v13 = vadd.f32 %v1064_v53, %v1032_v4  ;;  %v2852_v6 = vld [vmem:[#allocation3 + $0x28] sm:$0xff]  ;;  %v1185_v9 = vor.u32 1.1754944e-38, %v1184_v59  ;;  %v1100_v53 = vmul.f32 %v1593_v15, %v1092_v46  ;;  %v1093_v46 = vld [vmem:[#allocation4 + $0x38] sm:$0xff] }
 0x1b5   : > { %1085 = vst.msk [vmem:[#allocation3 + $0x38] sm:$0xff] %vm3311_vm8, %v1076_v17  ;;  %1596 = vrcp.f32 %v2852_v6  ;;  %v2859_v0 = vld [vmem:[#allocation3 + $0x8] sm:$0xff]  ;;  %v1176_v24 = vmul.f32 %v2845_v57, %v1175_v45  ;;  %v1203_v58 = vsub.f32 1.0, %v1202_v49  ;;  %v1095_v40 = vmul.f32 %v2826_v41, %v1087_v1 }
 0x1b6   : > { %1110 = vst.msk [vmem:[#allocation4] sm:$0xff] %vm3312_vm3, %v1102_v61  ;;  %1598 = vrcp.f32 %v2859_v0  ;;  %vm1220_vm15 = vweird.f32 %v2852_v6  ;;  %v1170_v60 = vand.u32 2147483648, %v2859_v0  ;;  %v1224_v36 = vand.u32 2147483647, %v2852_v6 }
 0x1b7   : > { %1081 = vst.msk [vmem:[#allocation3 + $0x18] sm:$0xff] %vm3313_vm10, %v1072_v13  ;;  %v1177_v37 = vadd.f32 %v2845_v57, %v1176_v24  ;;  %v1098_v13 = vmul.f32 %v2796_v52, %v1090_v43  ;;  %v1226_v52 = vand.u32 2147483648, %v2852_v6  ;;  %vm1164_vm5 = vweird.f32 %v2859_v0 }
 0x1b9   : > { %v1181_v50 = vsel %vm2909_vm9, %v2845_v57, %v1177_v37  ;;  %v1204_v57 = vmul.f32 %v2865_v55, %v1203_v58  ;;  %v1227_v49 = vor.u32 1.1754944e-38, %v1226_v52  ;;  %vm1225_vm9 = vcmp.eq.f32.partialorder %v1224_v36, 8.507059e+37 }
 0x1ba   : > { %v987_v35 = vpop.xlane.xlu0 %986  ;;  %v1186_v5 = vsel %vm1183_vm14, %v1185_v9, %v1181_v50  ;;  %v1210_v9 = vand.u32 2147483647, %v2841_v19 }
 0x1bb   : > { %v1104_v20 = vadd.f32 %v1096_v32, %v987_v35  ;;  %v992_v10 = vpop.xlane.xlu1 %991  ;;  %v1047_v56 = vpop.xlane.xlu2 %1046 }
 0x1bc   : > { %v1105_v39 = vadd.f32 %v1097_v22, %v992_v10  ;;  %v1075_v14 = vadd.f32 %v1067_v38, %v1047_v56  ;;  %v2878_v2 = vpop.eup %1596  ;;  %v2880_v29 = vld [vmem:[#allocation3 + $0x38] sm:$0xff]  ;;  %v1168_v10 = vand.u32 2147483647, %v2859_v0 }
 0x1bd   : > { %v1129_v3 = vld [vmem:[#allocation4] sm:$0xff]  ;;  %1112 = vst.msk [vmem:[#allocation4 + $0x10] sm:$0xff] %vm3316_vm13, %v1104_v20  ;;  %v2885_v11 = vpop.eup %1598  ;;  %v1216_v28 = vmul.f32 %v2878_v2, %v2852_v6  ;;  %vm1221_vm8 = vweird.f32 %v2878_v2  ;;  %vm1207_vm13 = vweird.f32 %v2865_v55  ;;  %v1252_v36 = vand.u32 2147483647, %v2880_v29 }
 0x1be   : > { %v1257_v25 = vmul.f32 %v1158_v27, %v1129_v3  ;;  %v2890_v26 = vld [vmem:[#allocation3 + $0x18] sm:$0xff]  ;;  %1113 = vst.msk [vmem:[#allocation4 + $0x18] sm:$0xff] %vm3317_vm7, %v1105_v39  ;;  %v1160_v51 = vmul.f32 %v2885_v11, %v2859_v0  ;;  %vm1165_vm10 = vweird.f32 %v2885_v11  ;;  %vm2947_vm0 = vmor %vm1220_vm15, %vm1221_vm8  ;;  %v1171_v3 = vor.u32 1.1754944e-38, %v1170_v60 }
 0x1bf   : > { %1600 = vrcp.f32 %v2890_v26  ;;  %1084 = vst.msk [vmem:[#allocation3 + $0x30] sm:$0xff] %vm3318_vm4, %v1075_v14  ;;  %v1217_v33 = vsub.f32 1.0, %v1216_v28  ;;  %v1198_v23 = vand.u32 2147483648, %v2890_v26  ;;  %vm3326_vm7 = vmmov %vm3322_vm1  ;;  %v1196_v56 = vand.u32 2147483647, %v2890_v26 }
 0x1c0   : > { %v1265_v8 = vadd.f32 1.0, %v1257_v25  ;;  %1602 = vrcp.f32 %v2880_v29  ;;  %v1161_v21 = vsub.f32 1.0, %v1160_v51  ;;  %vm2964_vm4 = vmor %vm1164_vm5, %vm1165_vm10  ;;  %vm1169_vm15 = vcmp.eq.f32.partialorder %v1168_v10, 8.507059e+37 }
 0x1c1   : > { %v1218_v7 = vmul.f32 %v2878_v2, %v1217_v33  ;;  %v1199_v51 = vor.u32 1.1754944e-38, %v1198_v23  ;;  %vm1197_vm8 = vcmp.eq.f32.partialorder %v1196_v56, 8.507059e+37  ;;  %vm3332_vm10 = vmmov %vm3323_vm2 }
 0x1c2   : > { %1273 = vst.msk [vmem:[%s2898_s29] sm:$0xff] %vm3321_vm12, %v1265_v8  ;;  %v1162_v44 = vmul.f32 %v2885_v11, %v1161_v21  ;;  %vm1192_vm12 = vweird.f32 %v2890_v26 }
 0x1c3   : > { %v982_v61 = vpop.xlane.xlu2 %981  ;;  %v1219_v41 = vadd.f32 %v2878_v2, %v1218_v7 }
 0x1c4   : > { %v1007_v4 = vpop.xlane.xlu1 %1006  ;;  %v1131_v45 = vld [vmem:[#allocation4 + $0x10] sm:$0xff]  ;;  %v1103_v42 = vadd.f32 %v1095_v40, %v982_v61  ;;  %v1163_v12 = vadd.f32 %v2885_v11, %v1162_v44 }
 0x1c5   : > { %v1108_v47 = vadd.f32 %v1100_v53, %v1007_v4  ;;  %v1601_v62 = vpop.eup %1600  ;;  %v1259_v15 = vmul.f32 %v1186_v5, %v1131_v45  ;;  %v1223_v20 = vsel %vm2947_vm0, %v2878_v2, %v1219_v41  ;;  %v1205_v2 = vadd.f32 %v2865_v55, %v1204_v57  ;;  %v1132_v8 = vld [vmem:[#allocation4 + $0x18] sm:$0xff] }
 0x1c6   : > { %v1002_v31 = vpop.xlane.xlu0 %1001  ;;  %v2928_v63 = vpop.eup %1602  ;;  %v1188_v16 = vmul.f32 %v1601_v62, %v2890_v26  ;;  %v2933_v24 = vld [vmem:[#allocation3 + $0x30] sm:$0xff]  ;;  %1111 = vst.msk [vmem:[#allocation4 + $0x8] sm:$0xff] %vm3323_vm2, %v1103_v42  ;;  %vm1193_vm11 = vweird.f32 %v1601_v62  ;;  %v1167_v14 = vsel %vm2964_vm4, %v2885_v11, %v1163_v12  ;;  %v1228_v37 = vsel %vm1225_vm9, %v1227_v49, %v1223_v20 }
 0x1c7   : > { %v1107_v17 = vadd.f32 %v1099_v48, %v1002_v31  ;;  %1116 = vst.msk [vmem:[#allocation4 + $0x30] sm:$0xff] %vm3322_vm1, %v1108_v47  ;;  %v1267_v32 = vadd.f32 1.0, %v1259_v15  ;;  %1604 = vrcp.f32 %v2933_v24  ;;  %v1244_v38 = vmul.f32 %v2928_v63, %v2880_v29  ;;  %vm1194_vm14 = vmor %vm1192_vm12, %vm1193_vm11 }
 0x1c8   : > { %v1189_v35 = vsub.f32 1.0, %v1188_v16  ;;  %v1172_v58 = vsel %vm1169_vm15, %v1171_v3, %v1167_v14  ;;  %v1212_v26 = vand.u32 2147483648, %v2841_v19  ;;  %v1101_v31 = vmul.f32 %v2838_v18, %v1093_v46 }
 0x1c9   : > { %1115 = vst.msk [vmem:[#allocation4 + $0x28] sm:$0xff] %vm3312_vm3, %v1107_v17  ;;  %v1245_v30 = vsub.f32 1.0, %v1244_v38  ;;  %vm3329_vm3 = vmmov %vm3322_vm1  ;;  %v1240_v40 = vand.u32 2147483648, %v2933_v24  ;;  %vm1234_vm0 = vweird.f32 %v2933_v24  ;;  %vm1249_vm11 = vweird.f32 %v2928_v63 }
 0x1ca   : > { %1275 = vst.msk [vmem:[%s2898_s29 + $0x10] sm:$0xff] %vm3326_vm7, %v1267_v32  ;;  %v1190_v6 = vmul.f32 %v1601_v62, %v1189_v35  ;;  %vm2981_vm1 = vmor %vm1206_vm6, %vm1207_vm13  ;;  %v1213_v19 = vor.u32 1.1754944e-38, %v1212_v26  ;;  %vm1211_vm13 = vcmp.eq.f32.partialorder %v1210_v9, 8.507059e+37  ;;  %v1254_v41 = vand.u32 2147483648, %v2880_v29 }
 0x1cb   : > { %v997_v0 = vpop.xlane.xlu2 %996  ;;  %v1246_v53 = vmul.f32 %v2928_v63, %v1245_v30  ;;  %v1209_v17 = vsel %vm2981_vm1, %v2865_v55, %v1205_v2  ;;  %vm3333_vm6 = vmmov %vm3329_vm3  ;;  %v1241_v45 = vor.u32 1.1754944e-38, %v1240_v40  ;;  %vm1248_vm12 = vweird.f32 %v2880_v29 }
 0x1cc   : > { %v1191_v27 = vadd.f32 %v1601_v62, %v1190_v6  ;;  %v1106_v28 = vadd.f32 %v1098_v13, %v997_v0  ;;  %v1238_v13 = vand.u32 2147483647, %v2933_v24  ;;  %vm3334_vm5 = vmmov %vm3329_vm3  ;;  %v1214_v47 = vsel %vm1211_vm13, %v1213_v19, %v1209_v17 }
 0x1cd   : > { %v1605_v25 = vpop.eup %1604  ;;  %v1130_v33 = vld [vmem:[#allocation4 + $0x8] sm:$0xff]  ;;  %v1247_v15 = vadd.f32 %v2928_v63, %v1246_v53  ;;  %vm3335_vm9 = vmmov %vm3329_vm3  ;;  %v1255_v35 = vor.u32 1.1754944e-38, %v1254_v41 }
 0x1ce   : > { %v1195_v1 = vsel %vm1194_vm14, %v1601_v62, %v1191_v27  ;;  %v1230_v11 = vmul.f32 %v1605_v25, %v2933_v24  ;;  %1114 = vst.msk [vmem:[#allocation4 + $0x20] sm:$0xff] %vm3329_vm3, %v1106_v28  ;;  %v1258_v21 = vmul.f32 %v1172_v58, %v1130_v33  ;;  %vm1235_vm2 = vweird.f32 %v1605_v25  ;;  %v1135_v52 = vld [vmem:[#allocation4 + $0x30] sm:$0xff]  ;;  %vm1250_vm14 = vmor %vm1248_vm12, %vm1249_vm11 }
 0x1cf   : > { %v1200_v34 = vsel %vm1197_vm8, %v1199_v51, %v1195_v1  ;;  %vm1236_vm7 = vmor %vm1234_vm0, %vm1235_vm2  ;;  %vm1239_vm4 = vcmp.eq.f32.partialorder %v1238_v13, 8.507059e+37  ;;  %v1251_v12 = vsel %vm1250_vm14, %v2928_v63, %v1247_v15 }
 0x1d0   : > { %v1134_v59 = vld [vmem:[#allocation4 + $0x28] sm:$0xff]  ;;  %v1260_v50 = vmul.f32 %v1200_v34, %v1132_v8  ;;  %v1231_v48 = vsub.f32 1.0, %v1230_v11  ;;  %v1266_v44 = vadd.f32 1.0, %v1258_v21  ;;  %vm3336_vm15 = vmmov %vm3329_vm3 }
 0x1d1   : > { %v1262_v54 = vmul.f32 %v1228_v37, %v1134_v59  ;;  %vm3337_vm8 = vmmov %vm3329_vm3  ;;  %vm1253_vm3 = vcmp.eq.f32.partialorder %v1252_v36, 8.507059e+37 }
 0x1d2   : > { %v1268_v4 = vadd.f32 1.0, %v1260_v50  ;;  %v1232_v61 = vmul.f32 %v1605_v25, %v1231_v48  ;;  %1274 = vst.msk [vmem:[%s2898_s29 + $0x8] sm:$0xff] %vm3333_vm6, %v1266_v44  ;;  %v1256_v22 = vsel %vm1253_vm3, %v1255_v35, %v1251_v12  ;;  %vm3338_vm1 = vmmov %vm3334_vm5 }
 0x1d3   : > { %v1270_v43 = vadd.f32 1.0, %v1262_v54  ;;  %v1012_v18 = vpop.xlane.xlu2 %1011 }
 0x1d4   : > { %1276 = vst.msk [vmem:[%s2898_s29 + $0x18] sm:$0xff] %vm3334_vm5, %v1268_v4  ;;  %v1233_v57 = vadd.f32 %v1605_v25, %v1232_v61  ;;  %v1109_v5 = vadd.f32 %v1101_v31, %v1012_v18 }
 0x1d5   : > { %1278 = vst.msk [vmem:[%s2898_s29 + $0x28] sm:$0xff] %vm3332_vm10, %v1270_v43  ;;  %v1133_v55 = vld [vmem:[#allocation4 + $0x20] sm:$0xff] }
 0x1d6   : > { %v1237_v42 = vsel %vm1236_vm7, %v1605_v25, %v1233_v57  ;;  %v1261_v62 = vmul.f32 %v1214_v47, %v1133_v55  ;;  %1117 = vst.msk [vmem:[#allocation4 + $0x38] sm:$0xff] %vm3335_vm9, %v1109_v5 }
 0x1d7   : > { %v1242_v60 = vsel %vm1239_vm4, %v1241_v45, %v1237_v42 }
 0x1d8   : > { %v1263_v16 = vmul.f32 %v1242_v60, %v1135_v52  ;;  %v1269_v24 = vadd.f32 1.0, %v1261_v62 }
 0x1da   : > { %v1271_v32 = vadd.f32 1.0, %v1263_v16  ;;  %1277 = vst.msk [vmem:[%s2898_s29 + $0x20] sm:$0xff] %vm3336_vm15, %v1269_v24 }
 0x1dc   : > { %1279 = vst.msk [vmem:[%s2898_s29 + $0x30] sm:$0xff] %vm3337_vm8, %v1271_v32 }
 0x1dd   : > { %v1136_v38 = vld [vmem:[#allocation4 + $0x38] sm:$0xff] }
 0x1de   : > { %v1264_v23 = vmul.f32 %v1256_v22, %v1136_v38 }
 0x1e0   : > { %v1272_v20 = vadd.f32 1.0, %v1264_v23 }
 0x1e2   : > { %1280 = vst.msk [vmem:[%s2898_s29 + $0x38] sm:$0xff] %vm3338_vm1, %v1272_v20 }
 0x1e3 PF: > { %s16_s17 = sadd.s32 1, %s1686_s17   ;;  %s3339_s12 = smov %s1670_s13 }
 0x1e4   : > { %p13_p0 = scmp.ge.s32.totalorder %s16_s17, 6   ;;  %s3340_s13 = smov %s1674_s14 }
 0x1e5   : > { %s3341_s14 = smov %s1765_s24  ;;  %s3342_s15 = smov %s1682_s16 }
 0x1e6   : > { %s3343_s16 = smov %s3345_s19  ;;  %15 = sbr.rel (!%p13_p0) target bundleno = 4 (0x4), region = 86 }
 0x1eb   :  { %1303 = vsyncpa [#allocation6], 1 }
 0x1ec   :  { %1305 = vsyncpa [#allocation6 + $0x1], 1 }

</bundles_post_ra>
